<compile_context>
chip_gen: v6e
topology: v6e:2x2x1
jax: 0.10.0
libtpu: 0.0.40
codegen_flags: <defaults>
</compile_context>

<pallas_src>
import functools

import jax
import jax.numpy as jnp
from jax.experimental import pallas as pl
from jax.experimental.pallas import tpu as pltpu  # noqa: F401  (TPU backend)
from jax.scipy.linalg import block_diag

HIDDEN = 32          # scaled-down hidden_size
NUM_CLASSES = 5
FLAT_PER_CH = 32     # (H/8)*(W/2) for input (32,16) -> flatten_dim//4


# ----------------------------------------------------------------------------
# Pallas kernel 1: fused conv (as matmul) + bias + activation + max-pool + shift
#   x_ref:    (n_pool, K, M)   per pool-offset im2col patches (lane-dense M)
#   w_ref:    (Cout, K)        BN-scale-folded conv weights
#   b_ref:    (Cout, 1)        BN-scale-folded bias
#   shift_ref:(Cout, 1)        BN shift (added after pooling)
#   o_ref:    (Cout, M)
# ----------------------------------------------------------------------------
def _conv_pool_kernel(x_ref, w_ref, b_ref, shift_ref, o_ref, *, n_pool, activation):
    w = w_ref[...]
    b = b_ref[...]

    def block(p):
        y = jnp.dot(w, x_ref[p], preferred_element_type=jnp.float32) + b
        if activation == "relu":
            y = jnp.maximum(y, 0.0)
        elif activation == "sigmoid":
            y = jax.nn.sigmoid(y)
        return y

    m = block(0)
    for p in range(1, n_pool):
        m = jnp.maximum(m, block(p))
    o_ref[...] = (m + shift_ref[...]).astype(o_ref.dtype)


def fused_conv_call(x_patches, w_mat, b_col, shift_col, activation):
    n_pool, K, M = x_patches.shape
    Cout = w_mat.shape[0]
    kernel = functools.partial(_conv_pool_kernel, n_pool=n_pool, activation=activation)
    return pl.pallas_call(
        kernel,
        out_shape=jax.ShapeDtypeStruct((Cout, M), jnp.float32),
        grid=(1,),
        in_specs=[
            pl.BlockSpec((n_pool, K, M), lambda i: (0, 0, 0)),
            pl.BlockSpec((Cout, K), lambda i: (0, 0)),
            pl.BlockSpec((Cout, 1), lambda i: (0, 0)),
            pl.BlockSpec((Cout, 1), lambda i: (0, 0)),
        ],
        out_specs=pl.BlockSpec((Cout, M), lambda i: (0, 0)),
    )(x_patches.astype(jnp.float32), w_mat, b_col, shift_col)


# ----------------------------------------------------------------------------
# Pallas kernel 2: all four classifier heads as one block-diagonal 3-layer MLP
#   (Dropout = identity in eval mode; sigmoid only on the VAD columns)
# ----------------------------------------------------------------------------
def _classifier_kernel(x_ref, w1_ref, b1_ref, w2_ref, b2_ref, w3_ref, b3_ref,
                       o_ref, *, num_linear):
    h = jnp.dot(x_ref[...], w1_ref[...], preferred_element_type=jnp.float32) + b1_ref[...]
    h = jnp.maximum(h, 0.0)
    h = jnp.dot(h, w2_ref[...], preferred_element_type=jnp.float32) + b2_ref[...]
    h = jnp.maximum(h, 0.0)
    o = jnp.dot(h, w3_ref[...], preferred_element_type=jnp.float32) + b3_ref[...]
    col = jax.lax.broadcasted_iota(jnp.int32, o.shape, 1)
    o_ref[...] = jnp.where(col < num_linear, o, jax.nn.sigmoid(o)).astype(o_ref.dtype)


def classifier_call(x_cls, w1, b1, w2, b2, w3, b3):
    B, D = x_cls.shape
    H = w1.shape[1]
    O = w3.shape[1]
    kernel = functools.partial(_classifier_kernel, num_linear=NUM_CLASSES)

    def spec(shape):
        return pl.BlockSpec(shape, lambda i: (0, 0))

    return pl.pallas_call(
        kernel,
        out_shape=jax.ShapeDtypeStruct((B, O), jnp.float32),
        grid=(1,),
        in_specs=[spec((B, D)), spec((D, H)), spec((1, H)),
                  spec((H, H)), spec((1, H)), spec((H, O)), spec((1, O))],
        out_specs=spec((B, O)),
    )(x_cls.astype(jnp.float32), w1, b1, w2, b2, w3, b3)


# ----------------------------------------------------------------------------
# XLA-side glue: im2col with pool-offset grouping (tiny tensors, pure reshuffle)
# ----------------------------------------------------------------------------
def conv_pool_patches(h, ph, pw):
    """'same' 3x3 conv followed by max-pool (ph,pw) -> patches (ph*pw, Cin*9, B*Ho*Wo)."""
    B, Cin, H, W = h.shape
    Hout, Wout = H // ph, W // pw
    hp = jnp.pad(h, ((0, 0), (0, 0), (1, 1), (1, 1)))
    blocks = []
    for pi in range(ph):
        for pj in range(pw):
            taps = []
            for di in range(3):
                for dj in range(3):
                    slab = hp[:, :, di:di + H, dj:dj + W]          # (B,Cin,H,W)
                    taps.append(slab[:, :, pi::ph, pj::pw])        # (B,Cin,Ho,Wo)
            t = jnp.stack(taps, axis=2)                            # (B,Cin,9,Ho,Wo)
            t = t.reshape(B, Cin * 9, Hout * Wout)
            t = t.transpose(1, 0, 2).reshape(Cin * 9, B * Hout * Wout)
            blocks.append(t)
    return jnp.stack(blocks, axis=0), (B, Hout, Wout)


def deconv_patches(x, stride, padding, output_padding):
    """ConvTranspose2d(k=3) as zero-insert + pad + valid conv; patches (1, Cin*9, B*Ho*Wo)."""
    B, Cin, H, W = x.shape
    sh, sw = stride
    oph, opw = output_padding
    k, p = 3, padding
    Hd, Wd = (H - 1) * sh + 1, (W - 1) * sw + 1
    xd = jnp.zeros((B, Cin, Hd, Wd), jnp.float32).at[:, :, ::sh, ::sw].set(x)
    lo = k - 1 - p
    xp = jnp.pad(xd, ((0, 0), (0, 0), (lo, lo + oph), (lo, lo + opw)))
    Hout, Wout = Hd + 2 * lo + oph - 2, Wd + 2 * lo + opw - 2
    taps = []
    for di in range(3):
        for dj in range(3):
            taps.append(xp[:, :, di:di + Hout, dj:dj + Wout])
    t = jnp.stack(taps, axis=2).reshape(B, Cin * 9, Hout * Wout)
    t = t.transpose(1, 0, 2).reshape(Cin * 9, B * Hout * Wout)
    return t[None], (B, Hout, Wout)


def unpack_output(o, B, Hout, Wout):
    Cout = o.shape[0]
    return o.reshape(Cout, B, Hout, Wout).transpose(1, 0, 2, 3)


# ----------------------------------------------------------------------------
# Parameters (deterministic xavier-normal weights, zero biases, eval-mode BN)
# ----------------------------------------------------------------------------
def init_params(key):
    keys = iter(jax.random.split(key, 32))

    def xavier(shape, fan_in, fan_out):
        std = (2.0 / (fan_in + fan_out)) ** 0.5
        return std * jax.random.normal(next(keys), shape, jnp.float32)

    def bn(c):
        return {"gamma": jnp.ones((c,)), "beta": jnp.zeros((c,)),
                "mean": jnp.zeros((c,)), "var": jnp.ones((c,))}

    p = {
        # encoder convs: (Cout, Cin, 3, 3)
        "conv1_w": xavier((2, 1, 3, 3), 9, 18), "conv1_b": jnp.zeros((2,)),
        "conv2_w": xavier((4, 2, 3, 3), 18, 36), "conv2_b": jnp.zeros((4,)),
        "conv3_w": xavier((4, 4, 3, 3), 36, 36), "conv3_b": jnp.zeros((4,)),
        "bn1": bn(2), "bn2": bn(4),
        # decoder transposed convs: (Cin, Cout, 3, 3) (quat=False branch)
        "t1_w": xavier((4, 4, 3, 3), 36, 36), "t1_b": jnp.zeros((4,)),
        "t2_w": xavier((4, 2, 3, 3), 18, 36), "t2_b": jnp.zeros((2,)),
        "t3_w": xavier((2, 1, 3, 3), 9, 18), "t3_b": jnp.zeros((1,)),
        "tbn1": bn(4), "tbn2": bn(2),
    }

    def mlp(out_dim):
        return {
            "w1": xavier((FLAT_PER_CH, HIDDEN), FLAT_PER_CH, HIDDEN), "b1": jnp.zeros((HIDDEN,)),
            "w2": xavier((HIDDEN, HIDDEN), HIDDEN, HIDDEN), "b2": jnp.zeros((HIDDEN,)),
            "w3": xavier((HIDDEN, out_dim), HIDDEN, out_dim), "b3": jnp.zeros((out_dim,)),
        }

    p["cls_discrete"] = mlp(NUM_CLASSES)
    p["cls_valence"] = mlp(1)
    p["cls_arousal"] = mlp(1)
    p["cls_dominance"] = mlp(1)
    return p


def prepare_params(p, eps=1e-5):
    """Fold eval-mode BN scales into conv weights, reshape to matmul layout,
    and pack the 4 classifier heads into one block-diagonal MLP."""

    def bn_affine(bn):
        scale = bn["gamma"] / jnp.sqrt(bn["var"] + eps)   # > 0: fold is exact
        shift = bn["beta"] - bn["mean"] * scale
        return scale, shift

    def stage(w, b, scale, shift):
        cout = w.shape[0]
        w_f = (w * scale[:, None, None, None]).reshape(cout, -1)
        return w_f, (b * scale).reshape(cout, 1), shift.reshape(cout, 1)

    def dec_stage(w_t, b, scale, shift):
        # transposed conv -> equivalent forward conv: flip spatial, swap in/out
        w_conv = jnp.flip(w_t, axis=(2, 3)).transpose(1, 0, 2, 3)
        return stage(w_conv, b, scale, shift)

    prep = {}
    s, t = bn_affine(p["bn1"])
    prep["enc1_w"], prep["enc1_b"], prep["enc1_s"] = stage(p["conv1_w"], p["conv1_b"], s, t)
    s, t = bn_affine(p["bn2"])
    prep["enc2_w"], prep["enc2_b"], prep["enc2_s"] = stage(p["conv2_w"], p["conv2_b"], s, t)
    prep["enc3_w"], prep["enc3_b"], prep["enc3_s"] = stage(
        p["conv3_w"], p["conv3_b"], jnp.ones((4,)), jnp.zeros((4,)))

    s, t = bn_affine(p["tbn1"])
    prep["dec1_w"], prep["dec1_b"], prep["dec1_s"] = dec_stage(p["t1_w"], p["t1_b"], s, t)
    s, t = bn_affine(p["tbn2"])
    prep["dec2_w"], prep["dec2_b"], prep["dec2_s"] = dec_stage(p["t2_w"], p["t2_b"], s, t)
    prep["dec3_w"], prep["dec3_b"], prep["dec3_s"] = dec_stage(
        p["t3_w"], p["t3_b"], jnp.ones((1,)), jnp.zeros((1,)))

    heads = [p["cls_discrete"], p["cls_valence"], p["cls_arousal"], p["cls_dominance"]]
    prep["cls_w1"] = block_diag(*[h["w1"] for h in heads])                 # (128,128)
    prep["cls_b1"] = jnp.concatenate([h["b1"] for h in heads]).reshape(1, -1)
    prep["cls_w2"] = block_diag(*[h["w2"] for h in heads])                 # (128,128)
    prep["cls_b2"] = jnp.concatenate([h["b2"] for h in heads]).reshape(1, -1)
    prep["cls_w3"] = block_diag(*[h["w3"] for h in heads])                 # (128,8)
    prep["cls_b3"] = jnp.concatenate([h["b3"] for h in heads]).reshape(1, -1)
    return jax.tree_util.tree_map(lambda a: a.astype(jnp.float32), prep)


# ----------------------------------------------------------------------------
# Forward pass (matches simple_autoencoder_2_vad.forward, eval mode, quat=False)
# ----------------------------------------------------------------------------
def forward(prep, x):
    # ---- encode (conv + relu + pool + BN fused per stage) ----
    xp, (B, H, W) = conv_pool_patches(x, 2, 2)
    h = unpack_output(fused_conv_call(xp, prep["enc1_w"], prep["enc1_b"], prep["enc1_s"], "relu"), B, H, W)
    xp, (_, H, W) = conv_pool_patches(h, 2, 1)
    h = unpack_output(fused_conv_call(xp, prep["enc2_w"], prep["enc2_b"], prep["enc2_s"], "relu"), B, H, W)
    xp, (_, H, W) = conv_pool_patches(h, 2, 1)
    enc = unpack_output(fused_conv_call(xp, prep["enc3_w"], prep["enc3_b"], prep["enc3_s"], "relu"), B, H, W)

    # ---- classifiers: one fused block-diagonal call (Dropout = identity) ----
    x_cls = jnp.concatenate([enc[:, c].reshape(B, -1) for c in range(4)], axis=1)  # (B,128)
    cls = classifier_call(x_cls, prep["cls_w1"], prep["cls_b1"],
                          prep["cls_w2"], prep["cls_b2"], prep["cls_w3"], prep["cls_b3"])
    pred_discrete = cls[:, :NUM_CLASSES]
    pred_valence = cls[:, NUM_CLASSES:NUM_CLASSES + 1]
    pred_arousal = cls[:, NUM_CLASSES + 1:NUM_CLASSES + 2]
    pred_dominance = cls[:, NUM_CLASSES + 2:NUM_CLASSES + 3]

    # ---- decode (t_conv + relu + BN fused; identity pools removed) ----
    dp, (_, H, W) = deconv_patches(enc, (2, 1), 1, (1, 0))
    d = unpack_output(fused_conv_call(dp, prep["dec1_w"], prep["dec1_b"], prep["dec1_s"], "relu"), B, H, W)
    dp, (_, H, W) = deconv_patches(d, (2, 1), 1, (1, 0))
    d = unpack_output(fused_conv_call(dp, prep["dec2_w"], prep["dec2_b"], prep["dec2_s"], "relu"), B, H, W)
    dp, (_, H, W) = deconv_patches(d, (2, 2), 1, (1, 1))
    recon = unpack_output(fused_conv_call(dp, prep["dec3_w"], prep["dec3_b"], prep["dec3_s"], "sigmoid"), B, H, W)

    return recon, pred_discrete, pred_valence, pred_arousal, pred_dominance


if __name__ == "__main__":
    key = jax.random.PRNGKey(0)
    pkey, xkey = jax.random.split(key)
    params = init_params(pkey)
    prep = prepare_params(params)     # one-time weight fold / packing (outside jit)

    # NCHW input, 1 channel, small spatial size (32, 16)
    x = jax.random.uniform(xkey, (2, 1, 32, 16), jnp.float32)

    fwd = jax.jit(forward)
    out = jax.block_until_ready(fwd(prep, x))

    recon, pd, pv, pa, pdo = out
    assert recon.shape == (2, 1, 32, 16)
    assert pd.shape == (2, NUM_CLASSES)
    assert pv.shape == (2, 1) and pa.shape == (2, 1) and pdo.shape == (2, 1)
    assert bool(jnp.all(jnp.isfinite(recon)))
    print("KERNEL_OK")
</pallas_src>

<mosaic_0001>
module attributes {stable_mosaic.version = 11 : i64} {
  func.func @_conv_pool_kernel(%arg0: i32, %arg1: memref<4x9x256xf32, #tpu.memory_space<vmem>>, %arg2: memref<2x9xf32, #tpu.memory_space<vmem>>, %arg3: memref<2x1xf32, #tpu.memory_space<vmem>>, %arg4: memref<2x1xf32, #tpu.memory_space<vmem>>, %arg5: memref<2x256xf32, #tpu.memory_space<vmem>>) attributes {dimension_semantics = [#tpu.dimension_semantics<arbitrary>], iteration_bounds = array<i64: 1>, scalar_prefetch = 0 : i64, scratch_operands = 0 : i64, tpu.core_type = #tpu.core_type<tc>, window_params = [{pipeline_mode = #tpu.pipeline_mode<synchronous>, transform_indices = @transform_0, window_bounds = array<i64: 4, 9, 256>}, {pipeline_mode = #tpu.pipeline_mode<synchronous>, transform_indices = @transform_1, window_bounds = array<i64: 2, 9>}, {pipeline_mode = #tpu.pipeline_mode<synchronous>, transform_indices = @transform_2, window_bounds = array<i64: 2, 1>}, {pipeline_mode = #tpu.pipeline_mode<synchronous>, transform_indices = @transform_3, window_bounds = array<i64: 2, 1>}, {pipeline_mode = #tpu.pipeline_mode<synchronous>, transform_indices = @transform_4, window_bounds = array<i64: 2, 256>}]} {
    %c0 = arith.constant 0 : index
    %c0_0 = arith.constant 0 : index
    %0 = vector.load %arg2[%c0, %c0_0] : memref<2x9xf32, #tpu.memory_space<vmem>>, vector<2x9xf32>
    %c0_1 = arith.constant 0 : index
    %c0_2 = arith.constant 0 : index
    %1 = vector.load %arg3[%c0_1, %c0_2] : memref<2x1xf32, #tpu.memory_space<vmem>>, vector<2x1xf32>
    %c0_3 = arith.constant 0 : index
    %c0_4 = arith.constant 0 : index
    %c0_5 = arith.constant 0 : index
    %2 = vector.load %arg1[%c0_3, %c0_4, %c0_5] : memref<4x9x256xf32, #tpu.memory_space<vmem>>, vector<1x9x256xf32>
    %3 = vector.shape_cast %2 : vector<1x9x256xf32> to vector<9x256xf32>
    %cst = arith.constant dense<0.000000e+00> : vector<2x256xf32>
    %4 = tpu.matmul %0, %3, %cst {dimension_numbers = #tpu.dot_dimension_numbers<[1], [0], [0], [1], [0, 0, 1, 1], [], []>} : vector<2x9xf32>, vector<9x256xf32>, vector<2x256xf32> -> vector<2x256xf32>
    %5 = vector.broadcast %1 : vector<2x1xf32> to vector<2x256xf32>
    %6 = arith.addf %4, %5 : vector<2x256xf32>
    %cst_6 = arith.constant 0.000000e+00 : f32
    %7 = vector.broadcast %cst_6 : f32 to vector<2x256xf32>
    %8 = arith.maximumf %6, %7 : vector<2x256xf32>
    %c1 = arith.constant 1 : index
    %c0_7 = arith.constant 0 : index
    %c0_8 = arith.constant 0 : index
    %9 = vector.load %arg1[%c1, %c0_7, %c0_8] : memref<4x9x256xf32, #tpu.memory_space<vmem>>, vector<1x9x256xf32>
    %10 = vector.shape_cast %9 : vector<1x9x256xf32> to vector<9x256xf32>
    %cst_9 = arith.constant dense<0.000000e+00> : vector<2x256xf32>
    %11 = tpu.matmul %0, %10, %cst_9 {dimension_numbers = #tpu.dot_dimension_numbers<[1], [0], [0], [1], [0, 0, 1, 1], [], []>} : vector<2x9xf32>, vector<9x256xf32>, vector<2x256xf32> -> vector<2x256xf32>
    %12 = vector.broadcast %1 : vector<2x1xf32> to vector<2x256xf32>
    %13 = arith.addf %11, %12 : vector<2x256xf32>
    %cst_10 = arith.constant 0.000000e+00 : f32
    %14 = vector.broadcast %cst_10 : f32 to vector<2x256xf32>
    %15 = arith.maximumf %13, %14 : vector<2x256xf32>
    %16 = arith.maximumf %8, %15 : vector<2x256xf32>
    %c2 = arith.constant 2 : index
    %c0_11 = arith.constant 0 : index
    %c0_12 = arith.constant 0 : index
    %17 = vector.load %arg1[%c2, %c0_11, %c0_12] : memref<4x9x256xf32, #tpu.memory_space<vmem>>, vector<1x9x256xf32>
    %18 = vector.shape_cast %17 : vector<1x9x256xf32> to vector<9x256xf32>
    %cst_13 = arith.constant dense<0.000000e+00> : vector<2x256xf32>
    %19 = tpu.matmul %0, %18, %cst_13 {dimension_numbers = #tpu.dot_dimension_numbers<[1], [0], [0], [1], [0, 0, 1, 1], [], []>} : vector<2x9xf32>, vector<9x256xf32>, vector<2x256xf32> -> vector<2x256xf32>
    %20 = vector.broadcast %1 : vector<2x1xf32> to vector<2x256xf32>
    %21 = arith.addf %19, %20 : vector<2x256xf32>
    %cst_14 = arith.constant 0.000000e+00 : f32
    %22 = vector.broadcast %cst_14 : f32 to vector<2x256xf32>
    %23 = arith.maximumf %21, %22 : vector<2x256xf32>
    %24 = arith.maximumf %16, %23 : vector<2x256xf32>
    %c3 = arith.constant 3 : index
    %c0_15 = arith.constant 0 : index
    %c0_16 = arith.constant 0 : index
    %25 = vector.load %arg1[%c3, %c0_15, %c0_16] : memref<4x9x256xf32, #tpu.memory_space<vmem>>, vector<1x9x256xf32>
    %26 = vector.shape_cast %25 : vector<1x9x256xf32> to vector<9x256xf32>
    %cst_17 = arith.constant dense<0.000000e+00> : vector<2x256xf32>
    %27 = tpu.matmul %0, %26, %cst_17 {dimension_numbers = #tpu.dot_dimension_numbers<[1], [0], [0], [1], [0, 0, 1, 1], [], []>} : vector<2x9xf32>, vector<9x256xf32>, vector<2x256xf32> -> vector<2x256xf32>
    %28 = vector.broadcast %1 : vector<2x1xf32> to vector<2x256xf32>
    %29 = arith.addf %27, %28 : vector<2x256xf32>
    %cst_18 = arith.constant 0.000000e+00 : f32
    %30 = vector.broadcast %cst_18 : f32 to vector<2x256xf32>
    %31 = arith.maximumf %29, %30 : vector<2x256xf32>
    %32 = arith.maximumf %24, %31 : vector<2x256xf32>
    %c0_19 = arith.constant 0 : index
    %c0_20 = arith.constant 0 : index
    %33 = vector.load %arg4[%c0_19, %c0_20] : memref<2x1xf32, #tpu.memory_space<vmem>>, vector<2x1xf32>
    %34 = vector.broadcast %33 : vector<2x1xf32> to vector<2x256xf32>
    %35 = arith.addf %32, %34 : vector<2x256xf32>
    %c0_21 = arith.constant 0 : index
    %c0_22 = arith.constant 0 : index
    %36 = vector.load %arg5[%c0_21, %c0_22] : memref<2x256xf32, #tpu.memory_space<vmem>>, vector<2x256xf32>
    tpu.vector_store %arg5[%c0_21, %c0_22], %35 {strides = array<i32>} : memref<2x256xf32, #tpu.memory_space<vmem>>, vector<2x256xf32>,
    return
  }
  func.func @transform_0(%arg0: i32) -> (i32, i32, i32) {
    %c0_i32 = arith.constant 0 : i32
    %c0_i32_0 = arith.constant 0 : i32
    %c0_i32_1 = arith.constant 0 : i32
    %c0_i32_2 = arith.constant 0 : i32
    return %c0_i32, %c0_i32_0, %c0_i32_1 : i32, i32, i32
  }
  func.func @transform_1(%arg0: i32) -> (i32, i32) {
    %c0_i32 = arith.constant 0 : i32
    %c0_i32_0 = arith.constant 0 : i32
    %c0_i32_1 = arith.constant 0 : i32
    return %c0_i32, %c0_i32_0 : i32, i32
  }
  func.func @transform_2(%arg0: i32) -> (i32, i32) {
    %c0_i32 = arith.constant 0 : i32
    %c0_i32_0 = arith.constant 0 : i32
    %c0_i32_1 = arith.constant 0 : i32
    return %c0_i32, %c0_i32_0 : i32, i32
  }
  func.func @transform_3(%arg0: i32) -> (i32, i32) {
    %c0_i32 = arith.constant 0 : i32
    %c0_i32_0 = arith.constant 0 : i32
    %c0_i32_1 = arith.constant 0 : i32
    return %c0_i32, %c0_i32_0 : i32, i32
  }
  func.func @transform_4(%arg0: i32) -> (i32, i32) {
    %c0_i32 = arith.constant 0 : i32
    %c0_i32_0 = arith.constant 0 : i32
    %c0_i32_1 = arith.constant 0 : i32
    return %c0_i32, %c0_i32_0 : i32, i32
  }
}

module attributes {stable_mosaic.version = 11 : i64} {
  func.func @_conv_pool_kernel(%arg0: i32, %arg1: memref<2x18x128xf32, #tpu.memory_space<vmem>>, %arg2: memref<4x18xf32, #tpu.memory_space<vmem>>, %arg3: memref<4x1xf32, #tpu.memory_space<vmem>>, %arg4: memref<4x1xf32, #tpu.memory_space<vmem>>, %arg5: memref<4x128xf32, #tpu.memory_space<vmem>>) attributes {dimension_semantics = [#tpu.dimension_semantics<arbitrary>], iteration_bounds = array<i64: 1>, scalar_prefetch = 0 : i64, scratch_operands = 0 : i64, tpu.core_type = #tpu.core_type<tc>, window_params = [{pipeline_mode = #tpu.pipeline_mode<synchronous>, transform_indices = @transform_0, window_bounds = array<i64: 2, 18, 128>}, {pipeline_mode = #tpu.pipeline_mode<synchronous>, transform_indices = @transform_1, window_bounds = array<i64: 4, 18>}, {pipeline_mode = #tpu.pipeline_mode<synchronous>, transform_indices = @transform_2, window_bounds = array<i64: 4, 1>}, {pipeline_mode = #tpu.pipeline_mode<synchronous>, transform_indices = @transform_3, window_bounds = array<i64: 4, 1>}, {pipeline_mode = #tpu.pipeline_mode<synchronous>, transform_indices = @transform_4, window_bounds = array<i64: 4, 128>}]} {
    %c0 = arith.constant 0 : index
    %c0_0 = arith.constant 0 : index
    %0 = vector.load %arg2[%c0, %c0_0] : memref<4x18xf32, #tpu.memory_space<vmem>>, vector<4x18xf32>
    %c0_1 = arith.constant 0 : index
    %c0_2 = arith.constant 0 : index
    %1 = vector.load %arg3[%c0_1, %c0_2] : memref<4x1xf32, #tpu.memory_space<vmem>>, vector<4x1xf32>
    %c0_3 = arith.constant 0 : index
    %c0_4 = arith.constant 0 : index
    %c0_5 = arith.constant 0 : index
    %2 = vector.load %arg1[%c0_3, %c0_4, %c0_5] : memref<2x18x128xf32, #tpu.memory_space<vmem>>, vector<1x18x128xf32>
    %3 = vector.shape_cast %2 : vector<1x18x128xf32> to vector<18x128xf32>
    %cst = arith.constant dense<0.000000e+00> : vector<4x128xf32>
    %4 = tpu.matmul %0, %3, %cst {dimension_numbers = #tpu.dot_dimension_numbers<[1], [0], [0], [1], [0, 0, 1, 1], [], []>} : vector<4x18xf32>, vector<18x128xf32>, vector<4x128xf32> -> vector<4x128xf32>
    %5 = vector.broadcast %1 : vector<4x1xf32> to vector<4x128xf32>
    %6 = arith.addf %4, %5 : vector<4x128xf32>
    %cst_6 = arith.constant 0.000000e+00 : f32
    %7 = vector.broadcast %cst_6 : f32 to vector<4x128xf32>
    %8 = arith.maximumf %6, %7 : vector<4x128xf32>
    %c1 = arith.constant 1 : index
    %c0_7 = arith.constant 0 : index
    %c0_8 = arith.constant 0 : index
    %9 = vector.load %arg1[%c1, %c0_7, %c0_8] : memref<2x18x128xf32, #tpu.memory_space<vmem>>, vector<1x18x128xf32>
    %10 = vector.shape_cast %9 : vector<1x18x128xf32> to vector<18x128xf32>
    %cst_9 = arith.constant dense<0.000000e+00> : vector<4x128xf32>
    %11 = tpu.matmul %0, %10, %cst_9 {dimension_numbers = #tpu.dot_dimension_numbers<[1], [0], [0], [1], [0, 0, 1, 1], [], []>} : vector<4x18xf32>, vector<18x128xf32>, vector<4x128xf32> -> vector<4x128xf32>
    %12 = vector.broadcast %1 : vector<4x1xf32> to vector<4x128xf32>
    %13 = arith.addf %11, %12 : vector<4x128xf32>
    %cst_10 = arith.constant 0.000000e+00 : f32
    %14 = vector.broadcast %cst_10 : f32 to vector<4x128xf32>
    %15 = arith.maximumf %13, %14 : vector<4x128xf32>
    %16 = arith.maximumf %8, %15 : vector<4x128xf32>
    %c0_11 = arith.constant 0 : index
    %c0_12 = arith.constant 0 : index
    %17 = vector.load %arg4[%c0_11, %c0_12] : memref<4x1xf32, #tpu.memory_space<vmem>>, vector<4x1xf32>
    %18 = vector.broadcast %17 : vector<4x1xf32> to vector<4x128xf32>
    %19 = arith.addf %16, %18 : vector<4x128xf32>
    %c0_13 = arith.constant 0 : index
    %c0_14 = arith.constant 0 : index
    %20 = vector.load %arg5[%c0_13, %c0_14] : memref<4x128xf32, #tpu.memory_space<vmem>>, vector<4x128xf32>
    tpu.vector_store %arg5[%c0_13, %c0_14], %19 {strides = array<i32>} : memref<4x128xf32, #tpu.memory_space<vmem>>, vector<4x128xf32>,
    return
  }
  func.func @transform_0(%arg0: i32) -> (i32, i32, i32) {
    %c0_i32 = arith.constant 0 : i32
    %c0_i32_0 = arith.constant 0 : i32
    %c0_i32_1 = arith.constant 0 : i32
    %c0_i32_2 = arith.constant 0 : i32
    return %c0_i32, %c0_i32_0, %c0_i32_1 : i32, i32, i32
  }
  func.func @transform_1(%arg0: i32) -> (i32, i32) {
    %c0_i32 = arith.constant 0 : i32
    %c0_i32_0 = arith.constant 0 : i32
    %c0_i32_1 = arith.constant 0 : i32
    return %c0_i32, %c0_i32_0 : i32, i32
  }
  func.func @transform_2(%arg0: i32) -> (i32, i32) {
    %c0_i32 = arith.constant 0 : i32
    %c0_i32_0 = arith.constant 0 : i32
    %c0_i32_1 = arith.constant 0 : i32
    return %c0_i32, %c0_i32_0 : i32, i32
  }
  func.func @transform_3(%arg0: i32) -> (i32, i32) {
    %c0_i32 = arith.constant 0 : i32
    %c0_i32_0 = arith.constant 0 : i32
    %c0_i32_1 = arith.constant 0 : i32
    return %c0_i32, %c0_i32_0 : i32, i32
  }
  func.func @transform_4(%arg0: i32) -> (i32, i32) {
    %c0_i32 = arith.constant 0 : i32
    %c0_i32_0 = arith.constant 0 : i32
    %c0_i32_1 = arith.constant 0 : i32
    return %c0_i32, %c0_i32_0 : i32, i32
  }
}

module attributes {stable_mosaic.version = 11 : i64} {
  func.func @_conv_pool_kernel(%arg0: i32, %arg1: memref<2x36x64xf32, #tpu.memory_space<vmem>>, %arg2: memref<4x36xf32, #tpu.memory_space<vmem>>, %arg3: memref<4x1xf32, #tpu.memory_space<vmem>>, %arg4: memref<4x1xf32, #tpu.memory_space<vmem>>, %arg5: memref<4x64xf32, #tpu.memory_space<vmem>>) attributes {dimension_semantics = [#tpu.dimension_semantics<arbitrary>], iteration_bounds = array<i64: 1>, scalar_prefetch = 0 : i64, scratch_operands = 0 : i64, tpu.core_type = #tpu.core_type<tc>, window_params = [{pipeline_mode = #tpu.pipeline_mode<synchronous>, transform_indices = @transform_0, window_bounds = array<i64: 2, 36, 64>}, {pipeline_mode = #tpu.pipeline_mode<synchronous>, transform_indices = @transform_1, window_bounds = array<i64: 4, 36>}, {pipeline_mode = #tpu.pipeline_mode<synchronous>, transform_indices = @transform_2, window_bounds = array<i64: 4, 1>}, {pipeline_mode = #tpu.pipeline_mode<synchronous>, transform_indices = @transform_3, window_bounds = array<i64: 4, 1>}, {pipeline_mode = #tpu.pipeline_mode<synchronous>, transform_indices = @transform_4, window_bounds = array<i64: 4, 64>}]} {
    %c0 = arith.constant 0 : index
    %c0_0 = arith.constant 0 : index
    %0 = vector.load %arg2[%c0, %c0_0] : memref<4x36xf32, #tpu.memory_space<vmem>>, vector<4x36xf32>
    %c0_1 = arith.constant 0 : index
    %c0_2 = arith.constant 0 : index
    %1 = vector.load %arg3[%c0_1, %c0_2] : memref<4x1xf32, #tpu.memory_space<vmem>>, vector<4x1xf32>
    %c0_3 = arith.constant 0 : index
    %c0_4 = arith.constant 0 : index
    %c0_5 = arith.constant 0 : index
    %2 = vector.load %arg1[%c0_3, %c0_4, %c0_5] : memref<2x36x64xf32, #tpu.memory_space<vmem>>, vector<1x36x64xf32>
    %3 = vector.shape_cast %2 : vector<1x36x64xf32> to vector<36x64xf32>
    %cst = arith.constant dense<0.000000e+00> : vector<4x64xf32>
    %4 = tpu.matmul %0, %3, %cst {dimension_numbers = #tpu.dot_dimension_numbers<[1], [0], [0], [1], [0, 0, 1, 1], [], []>} : vector<4x36xf32>, vector<36x64xf32>, vector<4x64xf32> -> vector<4x64xf32>
    %5 = vector.broadcast %1 : vector<4x1xf32> to vector<4x64xf32>
    %6 = arith.addf %4, %5 : vector<4x64xf32>
    %cst_6 = arith.constant 0.000000e+00 : f32
    %7 = vector.broadcast %cst_6 : f32 to vector<4x64xf32>
    %8 = arith.maximumf %6, %7 : vector<4x64xf32>
    %c1 = arith.constant 1 : index
    %c0_7 = arith.constant 0 : index
    %c0_8 = arith.constant 0 : index
    %9 = vector.load %arg1[%c1, %c0_7, %c0_8] : memref<2x36x64xf32, #tpu.memory_space<vmem>>, vector<1x36x64xf32>
    %10 = vector.shape_cast %9 : vector<1x36x64xf32> to vector<36x64xf32>
    %cst_9 = arith.constant dense<0.000000e+00> : vector<4x64xf32>
    %11 = tpu.matmul %0, %10, %cst_9 {dimension_numbers = #tpu.dot_dimension_numbers<[1], [0], [0], [1], [0, 0, 1, 1], [], []>} : vector<4x36xf32>, vector<36x64xf32>, vector<4x64xf32> -> vector<4x64xf32>
    %12 = vector.broadcast %1 : vector<4x1xf32> to vector<4x64xf32>
    %13 = arith.addf %11, %12 : vector<4x64xf32>
    %cst_10 = arith.constant 0.000000e+00 : f32
    %14 = vector.broadcast %cst_10 : f32 to vector<4x64xf32>
    %15 = arith.maximumf %13, %14 : vector<4x64xf32>
    %16 = arith.maximumf %8, %15 : vector<4x64xf32>
    %c0_11 = arith.constant 0 : index
    %c0_12 = arith.constant 0 : index
    %17 = vector.load %arg4[%c0_11, %c0_12] : memref<4x1xf32, #tpu.memory_space<vmem>>, vector<4x1xf32>
    %18 = vector.broadcast %17 : vector<4x1xf32> to vector<4x64xf32>
    %19 = arith.addf %16, %18 : vector<4x64xf32>
    %c0_13 = arith.constant 0 : index
    %c0_14 = arith.constant 0 : index
    %20 = vector.load %arg5[%c0_13, %c0_14] : memref<4x64xf32, #tpu.memory_space<vmem>>, vector<4x64xf32>
    tpu.vector_store %arg5[%c0_13, %c0_14], %19 {strides = array<i32>} : memref<4x64xf32, #tpu.memory_space<vmem>>, vector<4x64xf32>,
    return
  }
  func.func @transform_0(%arg0: i32) -> (i32, i32, i32) {
    %c0_i32 = arith.constant 0 : i32
    %c0_i32_0 = arith.constant 0 : i32
    %c0_i32_1 = arith.constant 0 : i32
    %c0_i32_2 = arith.constant 0 : i32
    return %c0_i32, %c0_i32_0, %c0_i32_1 : i32, i32, i32
  }
  func.func @transform_1(%arg0: i32) -> (i32, i32) {
    %c0_i32 = arith.constant 0 : i32
    %c0_i32_0 = arith.constant 0 : i32
    %c0_i32_1 = arith.constant 0 : i32
    return %c0_i32, %c0_i32_0 : i32, i32
  }
  func.func @transform_2(%arg0: i32) -> (i32, i32) {
    %c0_i32 = arith.constant 0 : i32
    %c0_i32_0 = arith.constant 0 : i32
    %c0_i32_1 = arith.constant 0 : i32
    return %c0_i32, %c0_i32_0 : i32, i32
  }
  func.func @transform_3(%arg0: i32) -> (i32, i32) {
    %c0_i32 = arith.constant 0 : i32
    %c0_i32_0 = arith.constant 0 : i32
    %c0_i32_1 = arith.constant 0 : i32
    return %c0_i32, %c0_i32_0 : i32, i32
  }
  func.func @transform_4(%arg0: i32) -> (i32, i32) {
    %c0_i32 = arith.constant 0 : i32
    %c0_i32_0 = arith.constant 0 : i32
    %c0_i32_1 = arith.constant 0 : i32
    return %c0_i32, %c0_i32_0 : i32, i32
  }
}

module attributes {stable_mosaic.version = 11 : i64} {
  func.func @_classifier_kernel(%arg0: i32, %arg1: memref<2x128xf32, #tpu.memory_space<vmem>>, %arg2: memref<128x128xf32, #tpu.memory_space<vmem>>, %arg3: memref<1x128xf32, #tpu.memory_space<vmem>>, %arg4: memref<128x128xf32, #tpu.memory_space<vmem>>, %arg5: memref<1x128xf32, #tpu.memory_space<vmem>>, %arg6: memref<128x8xf32, #tpu.memory_space<vmem>>, %arg7: memref<1x8xf32, #tpu.memory_space<vmem>>, %arg8: memref<2x8xf32, #tpu.memory_space<vmem>>) attributes {dimension_semantics = [#tpu.dimension_semantics<arbitrary>], iteration_bounds = array<i64: 1>, scalar_prefetch = 0 : i64, scratch_operands = 0 : i64, tpu.core_type = #tpu.core_type<tc>, window_params = [{pipeline_mode = #tpu.pipeline_mode<synchronous>, transform_indices = @transform_0, window_bounds = array<i64: 2, 128>}, {pipeline_mode = #tpu.pipeline_mode<synchronous>, transform_indices = @transform_1, window_bounds = array<i64: 128, 128>}, {pipeline_mode = #tpu.pipeline_mode<synchronous>, transform_indices = @transform_2, window_bounds = array<i64: 1, 128>}, {pipeline_mode = #tpu.pipeline_mode<synchronous>, transform_indices = @transform_3, window_bounds = array<i64: 128, 128>}, {pipeline_mode = #tpu.pipeline_mode<synchronous>, transform_indices = @transform_4, window_bounds = array<i64: 1, 128>}, {pipeline_mode = #tpu.pipeline_mode<synchronous>, transform_indices = @transform_5, window_bounds = array<i64: 128, 8>}, {pipeline_mode = #tpu.pipeline_mode<synchronous>, transform_indices = @transform_6, window_bounds = array<i64: 1, 8>}, {pipeline_mode = #tpu.pipeline_mode<synchronous>, transform_indices = @transform_7, window_bounds = array<i64: 2, 8>}]} {
    %c0 = arith.constant 0 : index
    %c0_0 = arith.constant 0 : index
    %0 = vector.load %arg1[%c0, %c0_0] : memref<2x128xf32, #tpu.memory_space<vmem>>, vector<2x128xf32>
    %c0_1 = arith.constant 0 : index
    %c0_2 = arith.constant 0 : index
    %1 = vector.load %arg2[%c0_1, %c0_2] : memref<128x128xf32, #tpu.memory_space<vmem>>, vector<128x128xf32>
    %cst = arith.constant dense<0.000000e+00> : vector<2x128xf32>
    %2 = tpu.matmul %0, %1, %cst {dimension_numbers = #tpu.dot_dimension_numbers<[1], [0], [0], [1], [0, 0, 1, 1], [], []>} : vector<2x128xf32>, vector<128x128xf32>, vector<2x128xf32> -> vector<2x128xf32>
    %c0_3 = arith.constant 0 : index
    %c0_4 = arith.constant 0 : index
    %3 = vector.load %arg3[%c0_3, %c0_4] : memref<1x128xf32, #tpu.memory_space<vmem>>, vector<1x128xf32>
    %4 = vector.broadcast %3 : vector<1x128xf32> to vector<2x128xf32>
    %5 = arith.addf %2, %4 : vector<2x128xf32>
    %cst_5 = arith.constant 0.000000e+00 : f32
    %6 = vector.broadcast %cst_5 : f32 to vector<2x128xf32>
    %7 = arith.maximumf %5, %6 : vector<2x128xf32>
    %c0_6 = arith.constant 0 : index
    %c0_7 = arith.constant 0 : index
    %8 = vector.load %arg4[%c0_6, %c0_7] : memref<128x128xf32, #tpu.memory_space<vmem>>, vector<128x128xf32>
    %cst_8 = arith.constant dense<0.000000e+00> : vector<2x128xf32>
    %9 = tpu.matmul %7, %8, %cst_8 {dimension_numbers = #tpu.dot_dimension_numbers<[1], [0], [0], [1], [0, 0, 1, 1], [], []>} : vector<2x128xf32>, vector<128x128xf32>, vector<2x128xf32> -> vector<2x128xf32>
    %c0_9 = arith.constant 0 : index
    %c0_10 = arith.constant 0 : index
    %10 = vector.load %arg5[%c0_9, %c0_10] : memref<1x128xf32, #tpu.memory_space<vmem>>, vector<1x128xf32>
    %11 = vector.broadcast %10 : vector<1x128xf32> to vector<2x128xf32>
    %12 = arith.addf %9, %11 : vector<2x128xf32>
    %cst_11 = arith.constant 0.000000e+00 : f32
    %13 = vector.broadcast %cst_11 : f32 to vector<2x128xf32>
    %14 = arith.maximumf %12, %13 : vector<2x128xf32>
    %c0_12 = arith.constant 0 : index
    %c0_13 = arith.constant 0 : index
    %15 = vector.load %arg6[%c0_12, %c0_13] : memref<128x8xf32, #tpu.memory_space<vmem>>, vector<128x8xf32>
    %cst_14 = arith.constant dense<0.000000e+00> : vector<2x8xf32>
    %16 = tpu.matmul %14, %15, %cst_14 {dimension_numbers = #tpu.dot_dimension_numbers<[1], [0], [0], [1], [0, 0, 1, 1], [], []>} : vector<2x128xf32>, vector<128x8xf32>, vector<2x8xf32> -> vector<2x8xf32>
    %c0_15 = arith.constant 0 : index
    %c0_16 = arith.constant 0 : index
    %17 = vector.load %arg7[%c0_15, %c0_16] : memref<1x8xf32, #tpu.memory_space<vmem>>, vector<1x8xf32>
    %18 = vector.broadcast %17 : vector<1x8xf32> to vector<2x8xf32>
    %19 = arith.addf %16, %18 : vector<2x8xf32>
    %20 = tpu.iota {dimensions = array<i32: 1>} : vector<2x8xi32>
    %c5_i32 = arith.constant 5 : i32
    %21 = vector.broadcast %c5_i32 : i32 to vector<2x8xi32>
    %22 = arith.cmpi slt, %20, %21 : vector<2x8xi32>
    %23 = arith.negf %19 : vector<2x8xf32>
    %24 = math.exp %23 : vector<2x8xf32>
    %cst_17 = arith.constant 1.000000e+00 : f32
    %25 = vector.broadcast %cst_17 : f32 to vector<2x8xf32>
    %26 = arith.addf %25, %24 : vector<2x8xf32>
    %27 = arith.divf %25, %26 : vector<2x8xf32>
    %28 = arith.select %22, %19, %27 : vector<2x8xi1>, vector<2x8xf32>
    %c0_18 = arith.constant 0 : index
    %c0_19 = arith.constant 0 : index
    %29 = vector.load %arg8[%c0_18, %c0_19] : memref<2x8xf32, #tpu.memory_space<vmem>>, vector<2x8xf32>
    tpu.vector_store %arg8[%c0_18, %c0_19], %28 {strides = array<i32>} : memref<2x8xf32, #tpu.memory_space<vmem>>, vector<2x8xf32>,
    return
  }
  func.func @transform_0(%arg0: i32) -> (i32, i32) {
    %c0_i32 = arith.constant 0 : i32
    %c0_i32_0 = arith.constant 0 : i32
    %c0_i32_1 = arith.constant 0 : i32
    return %c0_i32, %c0_i32_0 : i32, i32
  }
  func.func @transform_1(%arg0: i32) -> (i32, i32) {
    %c0_i32 = arith.constant 0 : i32
    %c0_i32_0 = arith.constant 0 : i32
    %c0_i32_1 = arith.constant 0 : i32
    return %c0_i32, %c0_i32_0 : i32, i32
  }
  func.func @transform_2(%arg0: i32) -> (i32, i32) {
    %c0_i32 = arith.constant 0 : i32
    %c0_i32_0 = arith.constant 0 : i32
    %c0_i32_1 = arith.constant 0 : i32
    return %c0_i32, %c0_i32_0 : i32, i32
  }
  func.func @transform_3(%arg0: i32) -> (i32, i32) {
    %c0_i32 = arith.constant 0 : i32
    %c0_i32_0 = arith.constant 0 : i32
    %c0_i32_1 = arith.constant 0 : i32
    return %c0_i32, %c0_i32_0 : i32, i32
  }
  func.func @transform_4(%arg0: i32) -> (i32, i32) {
    %c0_i32 = arith.constant 0 : i32
    %c0_i32_0 = arith.constant 0 : i32
    %c0_i32_1 = arith.constant 0 : i32
    return %c0_i32, %c0_i32_0 : i32, i32
  }
  func.func @transform_5(%arg0: i32) -> (i32, i32) {
    %c0_i32 = arith.constant 0 : i32
    %c0_i32_0 = arith.constant 0 : i32
    %c0_i32_1 = arith.constant 0 : i32
    return %c0_i32, %c0_i32_0 : i32, i32
  }
  func.func @transform_6(%arg0: i32) -> (i32, i32) {
    %c0_i32 = arith.constant 0 : i32
    %c0_i32_0 = arith.constant 0 : i32
    %c0_i32_1 = arith.constant 0 : i32
    return %c0_i32, %c0_i32_0 : i32, i32
  }
  func.func @transform_7(%arg0: i32) -> (i32, i32) {
    %c0_i32 = arith.constant 0 : i32
    %c0_i32_0 = arith.constant 0 : i32
    %c0_i32_1 = arith.constant 0 : i32
    return %c0_i32, %c0_i32_0 : i32, i32
  }
}

module attributes {stable_mosaic.version = 11 : i64} {
  func.func @_conv_pool_kernel(%arg0: i32, %arg1: memref<1x36x128xf32, #tpu.memory_space<vmem>>, %arg2: memref<4x36xf32, #tpu.memory_space<vmem>>, %arg3: memref<4x1xf32, #tpu.memory_space<vmem>>, %arg4: memref<4x1xf32, #tpu.memory_space<vmem>>, %arg5: memref<4x128xf32, #tpu.memory_space<vmem>>) attributes {dimension_semantics = [#tpu.dimension_semantics<arbitrary>], iteration_bounds = array<i64: 1>, scalar_prefetch = 0 : i64, scratch_operands = 0 : i64, tpu.core_type = #tpu.core_type<tc>, window_params = [{pipeline_mode = #tpu.pipeline_mode<synchronous>, transform_indices = @transform_0, window_bounds = array<i64: 1, 36, 128>}, {pipeline_mode = #tpu.pipeline_mode<synchronous>, transform_indices = @transform_1, window_bounds = array<i64: 4, 36>}, {pipeline_mode = #tpu.pipeline_mode<synchronous>, transform_indices = @transform_2, window_bounds = array<i64: 4, 1>}, {pipeline_mode = #tpu.pipeline_mode<synchronous>, transform_indices = @transform_3, window_bounds = array<i64: 4, 1>}, {pipeline_mode = #tpu.pipeline_mode<synchronous>, transform_indices = @transform_4, window_bounds = array<i64: 4, 128>}]} {
    %c0 = arith.constant 0 : index
    %c0_0 = arith.constant 0 : index
    %0 = vector.load %arg2[%c0, %c0_0] : memref<4x36xf32, #tpu.memory_space<vmem>>, vector<4x36xf32>
    %c0_1 = arith.constant 0 : index
    %c0_2 = arith.constant 0 : index
    %1 = vector.load %arg3[%c0_1, %c0_2] : memref<4x1xf32, #tpu.memory_space<vmem>>, vector<4x1xf32>
    %c0_3 = arith.constant 0 : index
    %c0_4 = arith.constant 0 : index
    %c0_5 = arith.constant 0 : index
    %2 = vector.load %arg1[%c0_3, %c0_4, %c0_5] : memref<1x36x128xf32, #tpu.memory_space<vmem>>, vector<1x36x128xf32>
    %3 = vector.shape_cast %2 : vector<1x36x128xf32> to vector<36x128xf32>
    %cst = arith.constant dense<0.000000e+00> : vector<4x128xf32>
    %4 = tpu.matmul %0, %3, %cst {dimension_numbers = #tpu.dot_dimension_numbers<[1], [0], [0], [1], [0, 0, 1, 1], [], []>} : vector<4x36xf32>, vector<36x128xf32>, vector<4x128xf32> -> vector<4x128xf32>
    %5 = vector.broadcast %1 : vector<4x1xf32> to vector<4x128xf32>
    %6 = arith.addf %4, %5 : vector<4x128xf32>
    %cst_6 = arith.constant 0.000000e+00 : f32
    %7 = vector.broadcast %cst_6 : f32 to vector<4x128xf32>
    %8 = arith.maximumf %6, %7 : vector<4x128xf32>
    %c0_7 = arith.constant 0 : index
    %c0_8 = arith.constant 0 : index
    %9 = vector.load %arg4[%c0_7, %c0_8] : memref<4x1xf32, #tpu.memory_space<vmem>>, vector<4x1xf32>
    %10 = vector.broadcast %9 : vector<4x1xf32> to vector<4x128xf32>
    %11 = arith.addf %8, %10 : vector<4x128xf32>
    %c0_9 = arith.constant 0 : index
    %c0_10 = arith.constant 0 : index
    %12 = vector.load %arg5[%c0_9, %c0_10] : memref<4x128xf32, #tpu.memory_space<vmem>>, vector<4x128xf32>
    tpu.vector_store %arg5[%c0_9, %c0_10], %11 {strides = array<i32>} : memref<4x128xf32, #tpu.memory_space<vmem>>, vector<4x128xf32>,
    return
  }
  func.func @transform_0(%arg0: i32) -> (i32, i32, i32) {
    %c0_i32 = arith.constant 0 : i32
    %c0_i32_0 = arith.constant 0 : i32
    %c0_i32_1 = arith.constant 0 : i32
    %c0_i32_2 = arith.constant 0 : i32
    return %c0_i32, %c0_i32_0, %c0_i32_1 : i32, i32, i32
  }
  func.func @transform_1(%arg0: i32) -> (i32, i32) {
    %c0_i32 = arith.constant 0 : i32
    %c0_i32_0 = arith.constant 0 : i32
    %c0_i32_1 = arith.constant 0 : i32
    return %c0_i32, %c0_i32_0 : i32, i32
  }
  func.func @transform_2(%arg0: i32) -> (i32, i32) {
    %c0_i32 = arith.constant 0 : i32
    %c0_i32_0 = arith.constant 0 : i32
    %c0_i32_1 = arith.constant 0 : i32
    return %c0_i32, %c0_i32_0 : i32, i32
  }
  func.func @transform_3(%arg0: i32) -> (i32, i32) {
    %c0_i32 = arith.constant 0 : i32
    %c0_i32_0 = arith.constant 0 : i32
    %c0_i32_1 = arith.constant 0 : i32
    return %c0_i32, %c0_i32_0 : i32, i32
  }
  func.func @transform_4(%arg0: i32) -> (i32, i32) {
    %c0_i32 = arith.constant 0 : i32
    %c0_i32_0 = arith.constant 0 : i32
    %c0_i32_1 = arith.constant 0 : i32
    return %c0_i32, %c0_i32_0 : i32, i32
  }
}

module attributes {stable_mosaic.version = 11 : i64} {
  func.func @_conv_pool_kernel(%arg0: i32, %arg1: memref<1x36x256xf32, #tpu.memory_space<vmem>>, %arg2: memref<2x36xf32, #tpu.memory_space<vmem>>, %arg3: memref<2x1xf32, #tpu.memory_space<vmem>>, %arg4: memref<2x1xf32, #tpu.memory_space<vmem>>, %arg5: memref<2x256xf32, #tpu.memory_space<vmem>>) attributes {dimension_semantics = [#tpu.dimension_semantics<arbitrary>], iteration_bounds = array<i64: 1>, scalar_prefetch = 0 : i64, scratch_operands = 0 : i64, tpu.core_type = #tpu.core_type<tc>, window_params = [{pipeline_mode = #tpu.pipeline_mode<synchronous>, transform_indices = @transform_0, window_bounds = array<i64: 1, 36, 256>}, {pipeline_mode = #tpu.pipeline_mode<synchronous>, transform_indices = @transform_1, window_bounds = array<i64: 2, 36>}, {pipeline_mode = #tpu.pipeline_mode<synchronous>, transform_indices = @transform_2, window_bounds = array<i64: 2, 1>}, {pipeline_mode = #tpu.pipeline_mode<synchronous>, transform_indices = @transform_3, window_bounds = array<i64: 2, 1>}, {pipeline_mode = #tpu.pipeline_mode<synchronous>, transform_indices = @transform_4, window_bounds = array<i64: 2, 256>}]} {
    %c0 = arith.constant 0 : index
    %c0_0 = arith.constant 0 : index
    %0 = vector.load %arg2[%c0, %c0_0] : memref<2x36xf32, #tpu.memory_space<vmem>>, vector<2x36xf32>
    %c0_1 = arith.constant 0 : index
    %c0_2 = arith.constant 0 : index
    %1 = vector.load %arg3[%c0_1, %c0_2] : memref<2x1xf32, #tpu.memory_space<vmem>>, vector<2x1xf32>
    %c0_3 = arith.constant 0 : index
    %c0_4 = arith.constant 0 : index
    %c0_5 = arith.constant 0 : index
    %2 = vector.load %arg1[%c0_3, %c0_4, %c0_5] : memref<1x36x256xf32, #tpu.memory_space<vmem>>, vector<1x36x256xf32>
    %3 = vector.shape_cast %2 : vector<1x36x256xf32> to vector<36x256xf32>
    %cst = arith.constant dense<0.000000e+00> : vector<2x256xf32>
    %4 = tpu.matmul %0, %3, %cst {dimension_numbers = #tpu.dot_dimension_numbers<[1], [0], [0], [1], [0, 0, 1, 1], [], []>} : vector<2x36xf32>, vector<36x256xf32>, vector<2x256xf32> -> vector<2x256xf32>
    %5 = vector.broadcast %1 : vector<2x1xf32> to vector<2x256xf32>
    %6 = arith.addf %4, %5 : vector<2x256xf32>
    %cst_6 = arith.constant 0.000000e+00 : f32
    %7 = vector.broadcast %cst_6 : f32 to vector<2x256xf32>
    %8 = arith.maximumf %6, %7 : vector<2x256xf32>
    %c0_7 = arith.constant 0 : index
    %c0_8 = arith.constant 0 : index
    %9 = vector.load %arg4[%c0_7, %c0_8] : memref<2x1xf32, #tpu.memory_space<vmem>>, vector<2x1xf32>
    %10 = vector.broadcast %9 : vector<2x1xf32> to vector<2x256xf32>
    %11 = arith.addf %8, %10 : vector<2x256xf32>
    %c0_9 = arith.constant 0 : index
    %c0_10 = arith.constant 0 : index
    %12 = vector.load %arg5[%c0_9, %c0_10] : memref<2x256xf32, #tpu.memory_space<vmem>>, vector<2x256xf32>
    tpu.vector_store %arg5[%c0_9, %c0_10], %11 {strides = array<i32>} : memref<2x256xf32, #tpu.memory_space<vmem>>, vector<2x256xf32>,
    return
  }
  func.func @transform_0(%arg0: i32) -> (i32, i32, i32) {
    %c0_i32 = arith.constant 0 : i32
    %c0_i32_0 = arith.constant 0 : i32
    %c0_i32_1 = arith.constant 0 : i32
    %c0_i32_2 = arith.constant 0 : i32
    return %c0_i32, %c0_i32_0, %c0_i32_1 : i32, i32, i32
  }
  func.func @transform_1(%arg0: i32) -> (i32, i32) {
    %c0_i32 = arith.constant 0 : i32
    %c0_i32_0 = arith.constant 0 : i32
    %c0_i32_1 = arith.constant 0 : i32
    return %c0_i32, %c0_i32_0 : i32, i32
  }
  func.func @transform_2(%arg0: i32) -> (i32, i32) {
    %c0_i32 = arith.constant 0 : i32
    %c0_i32_0 = arith.constant 0 : i32
    %c0_i32_1 = arith.constant 0 : i32
    return %c0_i32, %c0_i32_0 : i32, i32
  }
  func.func @transform_3(%arg0: i32) -> (i32, i32) {
    %c0_i32 = arith.constant 0 : i32
    %c0_i32_0 = arith.constant 0 : i32
    %c0_i32_1 = arith.constant 0 : i32
    return %c0_i32, %c0_i32_0 : i32, i32
  }
  func.func @transform_4(%arg0: i32) -> (i32, i32) {
    %c0_i32 = arith.constant 0 : i32
    %c0_i32_0 = arith.constant 0 : i32
    %c0_i32_1 = arith.constant 0 : i32
    return %c0_i32, %c0_i32_0 : i32, i32
  }
}

module attributes {stable_mosaic.version = 11 : i64} {
  func.func @_conv_pool_kernel(%arg0: i32, %arg1: memref<1x18x1024xf32, #tpu.memory_space<vmem>>, %arg2: memref<1x18xf32, #tpu.memory_space<vmem>>, %arg3: memref<1x1xf32, #tpu.memory_space<vmem>>, %arg4: memref<1x1xf32, #tpu.memory_space<vmem>>, %arg5: memref<1x1024xf32, #tpu.memory_space<vmem>>) attributes {dimension_semantics = [#tpu.dimension_semantics<arbitrary>], iteration_bounds = array<i64: 1>, scalar_prefetch = 0 : i64, scratch_operands = 0 : i64, tpu.core_type = #tpu.core_type<tc>, window_params = [{pipeline_mode = #tpu.pipeline_mode<synchronous>, transform_indices = @transform_0, window_bounds = array<i64: 1, 18, 1024>}, {pipeline_mode = #tpu.pipeline_mode<synchronous>, transform_indices = @transform_1, window_bounds = array<i64: 1, 18>}, {pipeline_mode = #tpu.pipeline_mode<synchronous>, transform_indices = @transform_2, window_bounds = array<i64: 1, 1>}, {pipeline_mode = #tpu.pipeline_mode<synchronous>, transform_indices = @transform_3, window_bounds = array<i64: 1, 1>}, {pipeline_mode = #tpu.pipeline_mode<synchronous>, transform_indices = @transform_4, window_bounds = array<i64: 1, 1024>}]} {
    %c0 = arith.constant 0 : index
    %c0_0 = arith.constant 0 : index
    %0 = vector.load %arg2[%c0, %c0_0] : memref<1x18xf32, #tpu.memory_space<vmem>>, vector<1x18xf32>
    %c0_1 = arith.constant 0 : index
    %c0_2 = arith.constant 0 : index
    %1 = vector.load %arg3[%c0_1, %c0_2] : memref<1x1xf32, #tpu.memory_space<vmem>>, vector<1x1xf32>
    %c0_3 = arith.constant 0 : index
    %c0_4 = arith.constant 0 : index
    %c0_5 = arith.constant 0 : index
    %2 = vector.load %arg1[%c0_3, %c0_4, %c0_5] : memref<1x18x1024xf32, #tpu.memory_space<vmem>>, vector<1x18x1024xf32>
    %3 = vector.shape_cast %2 : vector<1x18x1024xf32> to vector<18x1024xf32>
    %cst = arith.constant dense<0.000000e+00> : vector<1x1024xf32>
    %4 = tpu.matmul %0, %3, %cst {dimension_numbers = #tpu.dot_dimension_numbers<[1], [0], [0], [1], [0, 0, 1, 1], [], []>} : vector<1x18xf32>, vector<18x1024xf32>, vector<1x1024xf32> -> vector<1x1024xf32>
    %5 = vector.broadcast %1 : vector<1x1xf32> to vector<1x1024xf32>
    %6 = arith.addf %4, %5 : vector<1x1024xf32>
    %7 = arith.negf %6 : vector<1x1024xf32>
    %8 = math.exp %7 : vector<1x1024xf32>
    %cst_6 = arith.constant 1.000000e+00 : f32
    %9 = vector.broadcast %cst_6 : f32 to vector<1x1024xf32>
    %10 = arith.addf %9, %8 : vector<1x1024xf32>
    %11 = arith.divf %9, %10 : vector<1x1024xf32>
    %c0_7 = arith.constant 0 : index
    %c0_8 = arith.constant 0 : index
    %12 = vector.load %arg4[%c0_7, %c0_8] : memref<1x1xf32, #tpu.memory_space<vmem>>, vector<1x1xf32>
    %13 = vector.broadcast %12 : vector<1x1xf32> to vector<1x1024xf32>
    %14 = arith.addf %11, %13 : vector<1x1024xf32>
    %c0_9 = arith.constant 0 : index
    %c0_10 = arith.constant 0 : index
    %15 = vector.load %arg5[%c0_9, %c0_10] : memref<1x1024xf32, #tpu.memory_space<vmem>>, vector<1x1024xf32>
    tpu.vector_store %arg5[%c0_9, %c0_10], %14 {strides = array<i32>} : memref<1x1024xf32, #tpu.memory_space<vmem>>, vector<1x1024xf32>,
    return
  }
  func.func @transform_0(%arg0: i32) -> (i32, i32, i32) {
    %c0_i32 = arith.constant 0 : i32
    %c0_i32_0 = arith.constant 0 : i32
    %c0_i32_1 = arith.constant 0 : i32
    %c0_i32_2 = arith.constant 0 : i32
    return %c0_i32, %c0_i32_0, %c0_i32_1 : i32, i32, i32
  }
  func.func @transform_1(%arg0: i32) -> (i32, i32) {
    %c0_i32 = arith.constant 0 : i32
    %c0_i32_0 = arith.constant 0 : i32
    %c0_i32_1 = arith.constant 0 : i32
    return %c0_i32, %c0_i32_0 : i32, i32
  }
  func.func @transform_2(%arg0: i32) -> (i32, i32) {
    %c0_i32 = arith.constant 0 : i32
    %c0_i32_0 = arith.constant 0 : i32
    %c0_i32_1 = arith.constant 0 : i32
    return %c0_i32, %c0_i32_0 : i32, i32
  }
  func.func @transform_3(%arg0: i32) -> (i32, i32) {
    %c0_i32 = arith.constant 0 : i32
    %c0_i32_0 = arith.constant 0 : i32
    %c0_i32_1 = arith.constant 0 : i32
    return %c0_i32, %c0_i32_0 : i32, i32
  }
  func.func @transform_4(%arg0: i32) -> (i32, i32) {
    %c0_i32 = arith.constant 0 : i32
    %c0_i32_0 = arith.constant 0 : i32
    %c0_i32_1 = arith.constant 0 : i32
    return %c0_i32, %c0_i32_0 : i32, i32
  }
}

</mosaic_0001>

<bundles_post_ra>
// kernel: forward.7
= control target key start
LH: loop header
LB: loop body
LE: loop exit
PB: predicated region body
PF: predicated region fallthrough
CT: control target
= control target key end

     0   :  { %9 = vsyncpa [#allocation3], 0  ;;  %s458_s15 = smov [#allocation2]   ;;  %s558_s0 = inlined_call_operand.vmem [shape: f32[4,9,256], index: 0, kind: input, shape index: {}]   ;;  %s559_s1 = inlined_call_operand.hbm [shape: f32[2,9], index: 1, kind: input, shape index: {}]   ;;  %s560_s2 = inlined_call_operand.vmem [shape: f32[2,1], index: 2, kind: input, shape index: {}]   ;;  %s561_s3 = inlined_call_operand.vmem [shape: f32[2,1], index: 3, kind: input, shape index: {}]   ;;  %s562_s4 = inlined_call_operand.vmem [shape: f32[2,256], index: 4, kind: output, shape index: {}]  }
   0x1   :  { %s18_s16 = sshll.u32 %s458_s15, 4  ;;  %s19_s16 = int_to_ptr.vmem [resolvable:$true] %s18_s16 }
   0x2   :  { %s444_s17 = scalar_lea.vmem %s19_s16, 32  ;;  %p449_p1 = scmp.lt.s32.totalorder %s19_s16, %s19_s16 }
   0x3   :  { %p445_p0 = scmp.ne.s32.totalorder %s19_s16, %s444_s17  ;;  %p450_p2 = scmp.lt.s32.totalorder %s444_s17, %s444_s17 }
   0x5   :  { %p451_p3 = por %p450_p2, %p449_p1 }
   0x7   :  { %p452_p4 = pnand %p451_p3, %p445_p0 }
   0x9   :  { %455 = shalt.err (!%p452_p4)
}
   0xa   :  { %21 = dma.hbm_to_vmem [thread:$0]  %s559_s1, 32, %s19_s16, [#allocation3]  }
   0xb   :  { %456 = dma.done.wait [#allocation3], 32  }
   0xc   :  { %457 = vsyncadd [#allocation3], 4294967264  ;;  %v459_v0 = vmov 0.0   ;;  %v460_v1 = vmov 0   ;;  %vm44_vm0 = vcmask 1040384   ;;  %v32_v6 = vld [vmem:[%s558_s0 + $0x8] sm:$0xff] }
   0xd   :  { %115 = vmatprep.mubr.f32.mxu0 %v459_v0  ;;  %199 = vmatprep.mubr.f32.mxu1 %v459_v0  ;;  %v34_v2 = vld [vmem:[%s558_s0 + $0x18] sm:$0x1]  ;;  %v33_v4 = vld [vmem:[%s558_s0 + $0x10] sm:$0x1]  ;;  %v411_v7 = vld [vmem:[%s558_s0 + $0x28] sm:$0xff]  ;;  %vm40_vm1 = vcmask 72704  }
   0xe   :  { %435 = vset.pattern.permute.xlu0 %v460_v1  ;;  %v413_v3 = vld [vmem:[%s558_s0 + $0x38] sm:$0x1]  ;;  %407 = vmatprep.subr.msk.mxu0 %vm44_vm0, %v34_v2  ;;  %v412_v5 = vld [vmem:[%s558_s0 + $0x30] sm:$0x1]  ;;  %v31_v8 = vld [vmem:[%s558_s0] sm:$0xff] }
   0xf   :  { %414 = vmatprep.subr.msk.mxu1 %vm44_vm0, %v413_v3  ;;  %408 = vmatpush1.msk.msra.mxu0 %vm44_vm0, %v33_v4  ;;  %v410_v9 = vld [vmem:[%s558_s0 + $0x20] sm:$0xff]  ;;  %v420_v11 = vld [vmem:[%s558_s0 + $0x58] sm:$0x1]  ;;  %v419_v13 = vld [vmem:[%s558_s0 + $0x50] sm:$0x1] }
  0x10   :  { %415 = vmatpush1.msk.msra.mxu1 %vm44_vm0, %v412_v5  ;;  %v29_v10 = vld [vmem:[#allocation2] sm:$0x3]  ;;  %81 = vmatprep.subr.mxu0 %v32_v6  ;;  %v427_v12 = vld [vmem:[%s558_s0 + $0x78] sm:$0x1]  ;;  %v426_v14 = vld [vmem:[%s558_s0 + $0x70] sm:$0x1] }
  0x11   :  { %165 = vmatprep.subr.mxu1 %v411_v7  ;;  %82 = vmatpush1.msra.mxu0 %v31_v8  ;;  %v418_v15 = vld [vmem:[%s558_s0 + $0x48] sm:$0xff]  ;;  %v417_v17 = vld [vmem:[%s558_s0 + $0x40] sm:$0xff] }
  0x12   :  { %166 = vmatpush1.msra.mxu1 %v410_v9  ;;  %409 = vmatmul.mubr.msk.f32.vlgmr.msra.gmra.mxu0 %vm40_vm1, %v29_v10  ;;  %v425_v16 = vld [vmem:[%s558_s0 + $0x68] sm:$0xff]  ;;  %v424_v18 = vld [vmem:[%s558_s0 + $0x60] sm:$0xff] }
  0x13   :  { %416 = vmatmul.mubr.msk.f32.vlgmr.msra.gmra.mxu1 %vm40_vm1, %v29_v10  ;;  %421 = vmatprep.subr.msk.mxu0 %vm44_vm0, %v420_v11  ;;  %v30_v19 = vld [vmem:[%s560_s2] sm:$0x3] }
  0x14   :  { %428 = vmatprep.subr.msk.mxu1 %vm44_vm0, %v427_v12  ;;  %422 = vmatpush1.msk.msra.mxu0 %vm44_vm0, %v419_v13  ;;  %v382_v20 = vld [vmem:[%s561_s3] sm:$0x3] }
  0x15   :  { %429 = vmatpush1.msk.msra.mxu1 %vm44_vm0, %v426_v14  ;;  %251 = vmatprep.subr.mxu0 %v418_v15 }
  0x16   :  { %337 = vmatprep.subr.mxu1 %v425_v16  ;;  %252 = vmatpush1.msra.mxu0 %v417_v17 }
  0x17   :  { %285 = vmatprep.mubr.f32.mxu0 %v459_v0  ;;  %338 = vmatpush1.msra.mxu1 %v424_v18 }
  0x18   :  { %371 = vmatprep.mubr.f32.mxu1 %v459_v0  ;;  %423 = vmatmul.mubr.msk.f32.vlgmr.msra.gmra.mxu0 %vm40_vm1, %v29_v10 }
  0x19   :  { %430 = vmatmul.mubr.msk.f32.vlgmr.msra.gmra.mxu1 %vm40_vm1, %v29_v10  ;;  %37 = vperm.xlu0 %435, %v30_v19  }
  0x1d   :  { %385 = vperm.xlu0 %435, %v382_v20  }
  0x94   :  { %v38_v21 = vpop.permute.xlu0 %37 }
  0x98   :  { %v386_v52 = vpop.permute.xlu0 %385 }
  0xd2   :  { %v117_v22 = vpop.f32.mrf.mxu0 }
  0xd3   :  { %v201_v23 = vpop.f32.mrf.mxu1  ;;  %v118_v24 = vadd.f32 %v117_v22, %v38_v21 }
  0xd4   :  { %v202_v25 = vadd.f32 %v201_v23, %v38_v21  ;;  %v119_v26 = vpop.f32.mrf.mxu0 }
  0xd5   :  { %v203_v27 = vpop.f32.mrf.mxu1  ;;  %v120_v28 = vadd.f32 %v119_v26, %v38_v21  ;;  %v122_v30 = vmax.f32 %v118_v24, 0.0 }
  0xd6   :  { %v204_v29 = vadd.f32 %v203_v27, %v38_v21  ;;  %v206_v31 = vmax.f32 %v202_v25, 0.0 }
  0xd7   :  { %v123_v34 = vmax.f32 %v120_v28, 0.0 }
  0xd8   :  { %v287_v32 = vpop.f32.mrf.mxu0  ;;  %v207_v35 = vmax.f32 %v204_v29, 0.0  ;;  %v208_v40 = vmax.f32 %v122_v30, %v206_v31 }
  0xd9   :  { %v373_v33 = vpop.f32.mrf.mxu1  ;;  %v288_v36 = vadd.f32 %v287_v32, %v38_v21 }
  0xda   :  { %v374_v37 = vadd.f32 %v373_v33, %v38_v21  ;;  %v289_v38 = vpop.f32.mrf.mxu0  ;;  %v209_v44 = vmax.f32 %v123_v34, %v207_v35 }
  0xdb   :  { %v375_v39 = vpop.f32.mrf.mxu1  ;;  %v292_v41 = vmax.f32 %v288_v36, 0.0  ;;  %v290_v42 = vadd.f32 %v289_v38, %v38_v21 }
  0xdc   :  { %v376_v43 = vadd.f32 %v375_v39, %v38_v21  ;;  %v378_v46 = vmax.f32 %v374_v37, 0.0 }
  0xdd   :  { %v294_v45 = vmax.f32 %v208_v40, %v292_v41  ;;  %v293_v47 = vmax.f32 %v290_v42, 0.0 }
  0xde   :  { %v379_v50 = vmax.f32 %v376_v43, 0.0 }
  0xdf   :  { %v380_v48 = vmax.f32 %v294_v45, %v378_v46  ;;  %v295_v49 = vmax.f32 %v209_v44, %v293_v47 }
  0xe1   :  { %v381_v51 = vmax.f32 %v295_v49, %v379_v50  ;;  %v388_v53 = vadd.f32 %v386_v52, %v380_v48 }
  0xe3   :  { %v389_v54 = vadd.f32 %v386_v52, %v381_v51 }
  0xe5   :  { %v392_v55 = vcombine.low %v388_v53, %v389_v54 }
  0xe7   :  { %431 = vst.sshfl [vmem:[%s562_s4] sm:$0x33 pattern:$0x76325410] %v392_v55 }
  0xe8   :  { %406 = vsyncpa [#allocation3], 1 }

// kernel: forward.8
= control target key start
LH: loop header
LB: loop body
LE: loop exit
PB: predicated region body
PF: predicated region fallthrough
CT: control target
= control target key end

     0   :  { %vm31_vm0 = vcmask 1041408   ;;  %v234_v0 = vmov 0.0   ;;  %vm27_vm1 = vcmask 146432   ;;  %vm235_vm2 = vmmov 0   ;;  %s292_s0 = inlined_call_operand.vmem [shape: f32[2,18,128], index: 0, kind: input, shape index: {}]   ;;  %s293_s1 = inlined_call_operand.vmem [shape: f32[4,18], index: 1, kind: input, shape index: {}]   ;;  %s294_s2 = inlined_call_operand.vmem [shape: f32[4,1], index: 2, kind: input, shape index: {}]   ;;  %s295_s3 = inlined_call_operand.vmem [shape: f32[4,1], index: 3, kind: input, shape index: {}]   ;;  %s296_s4 = inlined_call_operand.vmem [shape: f32[4,128], index: 4, kind: output, shape index: {}]  }
   0x1   :  { %212 = vmatprep.subr.mxu0 %v234_v0  ;;  %221 = vmatprep.subr.mxu1 %v234_v0  ;;  %v21_v1 = vld [vmem:[%s292_s0 + $0x10] sm:$0x3]  ;;  %v201_v2 = vld [vmem:[%s292_s0 + $0x28] sm:$0x3]  ;;  %v200_v4 = vld [vmem:[%s292_s0 + $0x20] sm:$0xff]  ;;  %v236_v9 = vmov 0  }
   0x2   :  { %v20_v3 = vld [vmem:[%s292_s0 + $0x8] sm:$0xff]  ;;  %213 = vmatpush3.msk.msra.mxu0 %vm31_vm0, %v21_v1  ;;  %222 = vmatpush3.msk.msra.mxu1 %vm31_vm0, %v201_v2  ;;  %v19_v5 = vld [vmem:[%s292_s0] sm:$0xff]  ;;  %v199_v6 = vld [vmem:[%s292_s0 + $0x18] sm:$0xff] }
   0x3   :  { %214 = vmatprep.subr.mxu0 %v234_v0  ;;  %223 = vmatprep.subr.mxu1 %v234_v0  ;;  %v17_v7 = vld [vmem:[%s293_s1] sm:$0xf] }
   0x4   :  { %215 = vmatpush3.msra.mxu0 %v20_v3  ;;  %224 = vmatpush3.msra.mxu1 %v200_v4  ;;  %v18_v8 = vld [vmem:[%s294_s2] sm:$0xf] }
   0x5   :  { %216 = vmatprep.subr.mxu0 %v234_v0  ;;  %225 = vmatprep.subr.mxu1 %v234_v0  ;;  %v185_v10 = vld [vmem:[%s295_s3] sm:$0xf] }
   0x6   :  { %217 = vmatpush3.msra.mxu0 %v19_v5  ;;  %218 = vmatprep.mubr.msk.f32.mxu0 %vm235_vm2, %v234_v0 }
   0x7   :  { %226 = vmatpush3.msra.mxu1 %v199_v6  ;;  %227 = vmatprep.mubr.msk.f32.mxu1 %vm235_vm2, %v234_v0 }
   0x8   :  { %219 = vmatmul.mubr.msk.f32.vlgmr.msra.gmra.mxu0 %vm27_vm1, %v17_v7  ;;  %228 = vmatmul.mubr.msk.f32.vlgmr.msra.gmra.mxu1 %vm27_vm1, %v17_v7 }
   0x9   :  { %233 = vset.pattern.permute.xlu0 %v236_v9 }
   0xa   :  { %24 = vperm.xlu0 %233, %v18_v8  }
   0xe   :  { %188 = vperm.xlu0 %233, %v185_v10  }
  0x85   :  { %v25_v11 = vpop.permute.xlu0 %24 }
  0x89   :  { %v189_v21 = vpop.permute.xlu0 %188 }
  0xc8   :  { %v101_v12 = vpop.f32.mrf.mxu0  ;;  %v179_v13 = vpop.f32.mrf.mxu1 }
  0xc9   :  { %v102_v14 = vadd.f32 %v101_v12, %v25_v11  ;;  %v180_v15 = vadd.f32 %v179_v13, %v25_v11 }
  0xca   :  { %v220_v16 = vpop.f32.mrf.mxu0  ;;  %v229_v17 = vpop.f32.mrf.mxu1 }
  0xcb   :  { %v105_v18 = vmax.f32 %v102_v14, 0.0  ;;  %v183_v19 = vmax.f32 %v180_v15, 0.0 }
  0xcd   :  { %v184_v20 = vmax.f32 %v105_v18, %v183_v19 }
  0xcf   :  { %v191_v22 = vadd.f32 %v189_v21, %v184_v20 }
  0xd1   :  { %192 = vst [vmem:[%s296_s4] sm:$0xf] %v191_v22 }

// kernel: squeeze.4
= control target key start
LH: loop header
LB: loop body
LE: loop exit
PB: predicated region body
PF: predicated region fallthrough
CT: control target
= control target key end

     0   :  { %s30_s10 = smov 3  ;;  %s11_s11 = smov 3  ;;  %vm13_vm0 = vcmask 64512   ;;  %vm20_vm1 = vcmask 261312   ;;  %vm27_vm2 = vcmask 195712   ;;  %vm34_vm3 = vcmask 130112   ;;  %s70_s0 = inlined_call_operand.vmem [shape: f32[2,1,4,8], index: 0, kind: input, shape index: {}]   ;;  %s71_s1 = inlined_call_operand.vmem [shape: f32[2,32], index: 1, kind: output, shape index: {}]  }
   0x1   :  { %v44_v0 = vld [vmem:[%s70_s0 + $0x4] sm:$0xf]  ;;  %v9_v1 = vld [vmem:[%s70_s0] sm:$0xf]  ;;  %s16_s0 = smov 3  ;;  %s23_s12 = smov 3 }
   0x2   :  { %8 = vst [vmem:[#allocation1 + $0x8] sm:$0xf] %v44_v0  ;;  %10 = vst [vmem:[#allocation1] sm:$0xf] %v9_v1  ;;  %s48_s13 = smov 24   ;;  %s49_s14 = smov 8  }
   0x3   :  { %s50_s15 = smov 16  }
   0x9   :  { %v17_v2 = vld [vmem:[#allocation1 + $0x3] ss:$8 sm:%s16_s0]   ;;  %v31_v3 = vld [vmem:[#allocation1 + $0x1] ss:$8 sm:%s30_s10]   ;;  %v12_v4 = vld [vmem:[#allocation1] ss:$8 sm:%s11_s11]  }
   0xa   :  { %18 = vrot.lane.b32.xlu0 %v17_v2, %s48_s13  ;;  %32 = vrot.lane.b32.xlu1 %v31_v3, %s49_s14  ;;  %v24_v5 = vld [vmem:[#allocation1 + $0x2] ss:$8 sm:%s23_s12]   ;;  %14 = vst.msk [vmem:[#allocation0] sm:$0x3] %vm13_vm0, %v12_v4  }
   0xe   :  { %25 = vrot.lane.b32.xlu0 %v24_v5, %s50_s15 }
  0x7c   :  { %v19_v6 = vpop.permute.xlu0 %18   ;;  %v33_v7 = vpop.permute.xlu1 %32  }
  0x7d   :  { %21 = vst.msk [vmem:[#allocation0] sm:$0x3] %vm20_vm1, %v19_v6  }
  0x80   :  { %v26_v8 = vpop.permute.xlu0 %25  }
  0x81   :  { %28 = vst.msk [vmem:[#allocation0] sm:$0x3] %vm27_vm2, %v26_v8  }
  0x82   :  { %35 = vst.msk [vmem:[#allocation0] sm:$0x3] %vm34_vm3, %v33_v7  }
  0x89   :  { %v40_v9 = vld [vmem:[#allocation0] sm:$0x3] }
  0x8a   :  { %43 = vst [vmem:[%s71_s1] sm:$0x3] %v40_v9 }

// kernel: forward.9
= control target key start
LH: loop header
LB: loop body
LE: loop exit
PB: predicated region body
PF: predicated region fallthrough
CT: control target
= control target key end

     0   :  { %vm33_vm0 = vcmask 1043456   ;;  %v253_v0 = vmov 0.0   ;;  %vm29_vm1 = vcmask 293888   ;;  %vm254_vm2 = vmmov 0   ;;  %s323_s0 = inlined_call_operand.vmem [shape: f32[2,36,64], index: 0, kind: input, shape index: {}]   ;;  %s324_s1 = inlined_call_operand.vmem [shape: f32[4,36], index: 1, kind: input, shape index: {}]   ;;  %s325_s2 = inlined_call_operand.vmem [shape: f32[4,1], index: 2, kind: input, shape index: {}]   ;;  %s326_s3 = inlined_call_operand.vmem [shape: f32[4,1], index: 3, kind: input, shape index: {}]   ;;  %s327_s4 = inlined_call_operand.vmem [shape: f32[4,64], index: 4, kind: output, shape index: {}]  }
   0x1   :  { %223 = vmatprep.subr.mxu0 %v253_v0  ;;  %236 = vmatprep.subr.mxu1 %v253_v0  ;;  %v23_v1 = vld [vmem:[%s323_s0 + $0x20] sm:$0xf]  ;;  %v208_v2 = vld [vmem:[%s323_s0 + $0x48] sm:$0xf]  ;;  %v22_v3 = vld [vmem:[%s323_s0 + $0x18] sm:$0xff]  ;;  %v255_v13 = vmov 0  }
   0x2   :  { %224 = vmatpush3.msk.msra.mxu0 %vm33_vm0, %v23_v1  ;;  %237 = vmatpush3.msk.msra.mxu1 %vm33_vm0, %v208_v2  ;;  %v207_v4 = vld [vmem:[%s323_s0 + $0x40] sm:$0xff]  ;;  %v21_v5 = vld [vmem:[%s323_s0 + $0x10] sm:$0xff]  ;;  %v206_v6 = vld [vmem:[%s323_s0 + $0x38] sm:$0xff]  ;;  %vm196_vm3 = vcmask 519168  }
   0x3   :  { %225 = vmatprep.subr.mxu0 %v253_v0  ;;  %238 = vmatprep.subr.mxu1 %v253_v0  ;;  %v20_v7 = vld [vmem:[%s323_s0 + $0x8] sm:$0xff]  ;;  %v205_v8 = vld [vmem:[%s323_s0 + $0x30] sm:$0xff]  ;;  %v19_v9 = vld [vmem:[%s323_s0] sm:$0xff] }
   0x4   :  { %226 = vmatpush3.msra.mxu0 %v22_v3  ;;  %239 = vmatpush3.msra.mxu1 %v207_v4  ;;  %v204_v10 = vld [vmem:[%s323_s0 + $0x28] sm:$0xff]  ;;  %v17_v11 = vld [vmem:[%s324_s1] sm:$0xf] }
   0x5   :  { %227 = vmatprep.subr.mxu0 %v253_v0  ;;  %240 = vmatprep.subr.mxu1 %v253_v0  ;;  %v18_v12 = vld [vmem:[%s325_s2] sm:$0xf] }
   0x6   :  { %228 = vmatpush3.msra.mxu0 %v21_v5  ;;  %241 = vmatpush3.msra.mxu1 %v206_v6  ;;  %v189_v14 = vld [vmem:[%s326_s3] sm:$0xf] }
   0x7   :  { %229 = vmatprep.subr.mxu0 %v253_v0  ;;  %242 = vmatprep.subr.mxu1 %v253_v0 }
   0x8   :  { %230 = vmatpush3.msra.mxu0 %v20_v7  ;;  %243 = vmatpush3.msra.mxu1 %v205_v8 }
   0x9   :  { %231 = vmatprep.subr.mxu0 %v253_v0  ;;  %244 = vmatprep.subr.mxu1 %v253_v0 }
   0xa   :  { %232 = vmatpush3.msra.mxu0 %v19_v9  ;;  %233 = vmatprep.mubr.msk.f32.mxu0 %vm254_vm2, %v253_v0 }
   0xb   :  { %245 = vmatpush3.msra.mxu1 %v204_v10  ;;  %246 = vmatprep.mubr.msk.f32.mxu1 %vm254_vm2, %v253_v0 }
   0xc   :  { %234 = vmatmul.mubr.msk.f32.vlgmr.msra.gmra.mxu0 %vm29_vm1, %v17_v11  ;;  %247 = vmatmul.mubr.msk.f32.vlgmr.msra.gmra.mxu1 %vm29_vm1, %v17_v11 }
   0xd   :  { %252 = vset.pattern.permute.xlu0 %v255_v13 }
   0xe   :  { %26 = vperm.xlu0 %252, %v18_v12  }
  0x12   :  { %192 = vperm.xlu0 %252, %v189_v14  }
  0x89   :  { %v27_v15 = vpop.permute.xlu0 %26 }
  0x8d   :  { %v193_v25 = vpop.permute.xlu0 %192 }
  0xcc   :  { %v103_v16 = vpop.f32.mrf.mxu0  ;;  %v183_v17 = vpop.f32.mrf.mxu1 }
  0xcd   :  { %v104_v18 = vadd.f32 %v103_v16, %v27_v15  ;;  %v184_v19 = vadd.f32 %v183_v17, %v27_v15 }
  0xce   :  { %v235_v20 = vpop.f32.mrf.mxu0  ;;  %v248_v21 = vpop.f32.mrf.mxu1 }
  0xcf   :  { %v107_v22 = vmax.f32 %v104_v18, 0.0  ;;  %v187_v23 = vmax.f32 %v184_v19, 0.0 }
  0xd1   :  { %v188_v24 = vmax.f32 %v107_v22, %v187_v23 }
  0xd3   :  { %v195_v26 = vadd.f32 %v193_v25, %v188_v24 }
  0xd5   :  { %197 = vst.msk [vmem:[%s327_s4] sm:$0xf] %vm196_vm3, %v195_v26 }

// kernel: forward.10
= control target key start
LH: loop header
LB: loop body
LE: loop exit
PB: predicated region body
PF: predicated region fallthrough
CT: control target
= control target key end

     0   :  { %v490_v0 = vmov 0.0   ;;  %vm491_vm0 = vmmov 0   ;;  %vm318_vm2 = vcmask 58368   ;;  %s745_s1 = inlined_call_operand.vmem [shape: f32[128,128], index: 1, kind: input, shape index: {}]   ;;  %s746_s3 = inlined_call_operand.vmem [shape: f32[128,128], index: 3, kind: input, shape index: {}]   ;;  %s747_s0 = inlined_call_operand.vmem [shape: f32[2,128], index: 0, kind: input, shape index: {}]   ;;  %s748_s5 = inlined_call_operand.vmem [shape: f32[128,8], index: 5, kind: input, shape index: {}]   ;;  %s749_s2 = inlined_call_operand.vmem [shape: f32[1,128], index: 2, kind: input, shape index: {}]   ;;  %s750_s4 = inlined_call_operand.vmem [shape: f32[1,128], index: 4, kind: input, shape index: {}]   ;;  %s751_s6 = inlined_call_operand.vmem [shape: f32[1,8], index: 6, kind: input, shape index: {}]   ;;  %s752_s7 = inlined_call_operand.vmem [shape: f32[2,8], index: 7, kind: output, shape index: {}]  }
   0x1   :  { %379 = vmatprep.subr.mxu0 %v490_v0  ;;  %v42_v1 = vld [vmem:[%s745_s1 + $0x78] sm:$0xff]  ;;  %v41_v2 = vld [vmem:[%s745_s1 + $0x70] sm:$0xff]  ;;  %411 = vmatprep.mubr.msk.f32.mxu0 %vm491_vm0, %v490_v0  ;;  %v40_v3 = vld [vmem:[%s745_s1 + $0x68] sm:$0xff] }
   0x2   :  { %380 = vmatpush3.msra.mxu0 %v42_v1  ;;  %414 = vmatprep.subr.mxu1 %v490_v0  ;;  %v39_v4 = vld [vmem:[%s745_s1 + $0x60] sm:$0xff]  ;;  %v136_v5 = vld [vmem:[%s746_s3 + $0x78] sm:$0xff]  ;;  %v135_v7 = vld [vmem:[%s746_s3 + $0x70] sm:$0xff] }
   0x3   :  { %381 = vmatprep.subr.mxu0 %v490_v0  ;;  %446 = vmatprep.mubr.msk.f32.mxu1 %vm491_vm0, %v490_v0  ;;  %v38_v6 = vld [vmem:[%s745_s1 + $0x58] sm:$0xff]  ;;  %v134_v8 = vld [vmem:[%s746_s3 + $0x68] sm:$0xff]  ;;  %v37_v9 = vld [vmem:[%s745_s1 + $0x50] sm:$0xff] }
   0x4   :  { %382 = vmatpush3.msra.mxu0 %v41_v2  ;;  %415 = vmatpush3.msra.mxu1 %v136_v5  ;;  %v133_v10 = vld [vmem:[%s746_s3 + $0x60] sm:$0xff]  ;;  %v36_v11 = vld [vmem:[%s745_s1 + $0x48] sm:$0xff]  ;;  %v132_v12 = vld [vmem:[%s746_s3 + $0x58] sm:$0xff] }
   0x5   :  { %383 = vmatprep.subr.mxu0 %v490_v0  ;;  %416 = vmatprep.subr.mxu1 %v490_v0  ;;  %v35_v13 = vld [vmem:[%s745_s1 + $0x40] sm:$0xff]  ;;  %v131_v14 = vld [vmem:[%s746_s3 + $0x50] sm:$0xff]  ;;  %v34_v15 = vld [vmem:[%s745_s1 + $0x38] sm:$0xff] }
   0x6   :  { %384 = vmatpush3.msra.mxu0 %v40_v3  ;;  %417 = vmatpush3.msra.mxu1 %v135_v7  ;;  %v130_v16 = vld [vmem:[%s746_s3 + $0x48] sm:$0xff]  ;;  %v33_v17 = vld [vmem:[%s745_s1 + $0x30] sm:$0xff]  ;;  %v129_v18 = vld [vmem:[%s746_s3 + $0x40] sm:$0xff]  ;;  %v308_v3 = vlaneseq }
   0x7   :  { %385 = vmatprep.subr.mxu0 %v490_v0  ;;  %418 = vmatprep.subr.mxu1 %v490_v0  ;;  %v32_v19 = vld [vmem:[%s745_s1 + $0x28] sm:$0xff]  ;;  %v128_v20 = vld [vmem:[%s746_s3 + $0x38] sm:$0xff]  ;;  %v31_v21 = vld [vmem:[%s745_s1 + $0x20] sm:$0xff] }
   0x8   :  { %386 = vmatpush3.msra.mxu0 %v39_v4  ;;  %419 = vmatpush3.msra.mxu1 %v134_v8  ;;  %v127_v22 = vld [vmem:[%s746_s3 + $0x30] sm:$0xff]  ;;  %v30_v23 = vld [vmem:[%s745_s1 + $0x18] sm:$0xff]  ;;  %v126_v24 = vld [vmem:[%s746_s3 + $0x28] sm:$0xff]  ;;  %v309_v4 = vand.u32 127, %v308_v3 }
   0x9   :  { %387 = vmatprep.subr.mxu0 %v490_v0  ;;  %420 = vmatprep.subr.mxu1 %v490_v0  ;;  %v29_v25 = vld [vmem:[%s745_s1 + $0x10] sm:$0xff]  ;;  %v125_v26 = vld [vmem:[%s746_s3 + $0x20] sm:$0xff]  ;;  %v28_v27 = vld [vmem:[%s745_s1 + $0x8] sm:$0xff] }
   0xa   :  { %388 = vmatpush3.msra.mxu0 %v38_v6  ;;  %421 = vmatpush3.msra.mxu1 %v133_v10  ;;  %v124_v28 = vld [vmem:[%s746_s3 + $0x18] sm:$0xff]  ;;  %v27_v29 = vld [vmem:[%s745_s1] sm:$0xff]  ;;  %v123_v31 = vld [vmem:[%s746_s3 + $0x10] sm:$0xff]  ;;  %vm310_vm1 = vcmp.lt.s32.totalorder %v309_v4, 5 }
   0xb   :  { %389 = vmatprep.subr.mxu0 %v490_v0  ;;  %422 = vmatprep.subr.mxu1 %v490_v0  ;;  %v26_v30 = vld [vmem:[%s747_s0] sm:$0x3]  ;;  %v122_v32 = vld [vmem:[%s746_s3 + $0x8] sm:$0xff]  ;;  %v230_v34 = vld [vmem:[%s748_s5 + $0x78] sm:$0xff] }
   0xc   :  { %390 = vmatpush3.msra.mxu0 %v37_v9  ;;  %423 = vmatpush3.msra.mxu1 %v132_v12  ;;  %v121_v33 = vld [vmem:[%s746_s3] sm:$0xff]  ;;  %v229_v35 = vld [vmem:[%s748_s5 + $0x70] sm:$0xff]  ;;  %v228_v36 = vld [vmem:[%s748_s5 + $0x68] sm:$0xff] }
   0xd   :  { %391 = vmatprep.subr.mxu0 %v490_v0  ;;  %424 = vmatprep.subr.mxu1 %v490_v0  ;;  %v227_v37 = vld [vmem:[%s748_s5 + $0x60] sm:$0xff]  ;;  %v226_v38 = vld [vmem:[%s748_s5 + $0x58] sm:$0xff]  ;;  %v225_v39 = vld [vmem:[%s748_s5 + $0x50] sm:$0xff] }
   0xe   :  { %392 = vmatpush3.msra.mxu0 %v36_v11  ;;  %425 = vmatpush3.msra.mxu1 %v131_v14  ;;  %v224_v40 = vld [vmem:[%s748_s5 + $0x48] sm:$0xff]  ;;  %v223_v41 = vld [vmem:[%s748_s5 + $0x40] sm:$0xff]  ;;  %v222_v42 = vld [vmem:[%s748_s5 + $0x38] sm:$0xff] }
   0xf   :  { %393 = vmatprep.subr.mxu0 %v490_v0  ;;  %426 = vmatprep.subr.mxu1 %v490_v0  ;;  %v221_v43 = vld [vmem:[%s748_s5 + $0x30] sm:$0xff]  ;;  %v220_v44 = vld [vmem:[%s748_s5 + $0x28] sm:$0xff]  ;;  %v219_v45 = vld [vmem:[%s748_s5 + $0x20] sm:$0xff] }
  0x10   :  { %394 = vmatpush3.msra.mxu0 %v35_v13  ;;  %427 = vmatpush3.msra.mxu1 %v130_v16  ;;  %v218_v46 = vld [vmem:[%s748_s5 + $0x18] sm:$0xff]  ;;  %v324_v47 = vld [vmem:[%s749_s2] ss:$0 sm:$0xff]  ;;  %v217_v52 = vld [vmem:[%s748_s5 + $0x10] sm:$0xff] }
  0x11   :  { %395 = vmatprep.subr.mxu0 %v490_v0  ;;  %428 = vmatprep.subr.mxu1 %v490_v0  ;;  %v216_v53 = vld [vmem:[%s748_s5 + $0x8] sm:$0xff]  ;;  %v215_v54 = vld [vmem:[%s748_s5] sm:$0xff] }
  0x12   :  { %396 = vmatpush3.msra.mxu0 %v34_v15  ;;  %429 = vmatpush3.msra.mxu1 %v129_v18  ;;  %v325_v55 = vld [vmem:[%s750_s4] ss:$0 sm:$0xff] }
  0x13   :  { %397 = vmatprep.subr.mxu0 %v490_v0  ;;  %430 = vmatprep.subr.mxu1 %v490_v0  ;;  %v326_v60 = vld [vmem:[%s751_s6] ss:$0 sm:$0xff] }
  0x14   :  { %398 = vmatpush3.msra.mxu0 %v33_v17  ;;  %431 = vmatpush3.msra.mxu1 %v128_v20 }
  0x15   :  { %399 = vmatprep.subr.mxu0 %v490_v0  ;;  %432 = vmatprep.subr.mxu1 %v490_v0 }
  0x16   :  { %400 = vmatpush3.msra.mxu0 %v32_v19  ;;  %433 = vmatpush3.msra.mxu1 %v127_v22 }
  0x17   :  { %401 = vmatprep.subr.mxu0 %v490_v0  ;;  %434 = vmatprep.subr.mxu1 %v490_v0 }
  0x18   :  { %402 = vmatpush3.msra.mxu0 %v31_v21  ;;  %435 = vmatpush3.msra.mxu1 %v126_v24 }
  0x19   :  { %403 = vmatprep.subr.mxu0 %v490_v0  ;;  %436 = vmatprep.subr.mxu1 %v490_v0 }
  0x1a   :  { %404 = vmatpush3.msra.mxu0 %v30_v23  ;;  %437 = vmatpush3.msra.mxu1 %v125_v26 }
  0x1b   :  { %405 = vmatprep.subr.mxu0 %v490_v0  ;;  %438 = vmatprep.subr.mxu1 %v490_v0 }
  0x1c   :  { %406 = vmatpush3.msra.mxu0 %v29_v25  ;;  %439 = vmatpush3.msra.mxu1 %v124_v28 }
  0x1d   :  { %407 = vmatprep.subr.mxu0 %v490_v0  ;;  %440 = vmatprep.subr.mxu1 %v490_v0 }
  0x1e   :  { %408 = vmatpush3.msra.mxu0 %v28_v27  ;;  %441 = vmatpush3.msra.mxu1 %v123_v31 }
  0x1f   :  { %409 = vmatprep.subr.mxu0 %v490_v0  ;;  %442 = vmatprep.subr.mxu1 %v490_v0 }
  0x20   :  { %410 = vmatpush3.msra.mxu0 %v27_v29  ;;  %443 = vmatpush3.msra.mxu1 %v122_v32 }
  0x21   :  { %412 = vmatmul.mubr.f32.vlgmr.msra.gmra.mxu0 %v26_v30  ;;  %449 = vmatprep.subr.mxu0 %v490_v0 }
  0x22   :  { %481 = vmatprep.mubr.msk.f32.mxu0 %vm491_vm0, %v490_v0  ;;  %444 = vmatprep.subr.mxu1 %v490_v0 }
  0x23   :  { %445 = vmatpush3.msra.mxu1 %v121_v33  ;;  %450 = vmatpush3.msra.mxu0 %v230_v34 }
  0x24   :  { %451 = vmatprep.subr.mxu0 %v490_v0 }
  0x25   :  { %452 = vmatpush3.msra.mxu0 %v229_v35 }
  0x26   :  { %453 = vmatprep.subr.mxu0 %v490_v0 }
  0x27   :  { %454 = vmatpush3.msra.mxu0 %v228_v36 }
  0x28   :  { %455 = vmatprep.subr.mxu0 %v490_v0 }
  0x29   :  { %456 = vmatpush3.msra.mxu0 %v227_v37 }
  0x2a   :  { %457 = vmatprep.subr.mxu0 %v490_v0 }
  0x2b   :  { %458 = vmatpush3.msra.mxu0 %v226_v38 }
  0x2c   :  { %459 = vmatprep.subr.mxu0 %v490_v0 }
  0x2d   :  { %460 = vmatpush3.msra.mxu0 %v225_v39 }
  0x2e   :  { %461 = vmatprep.subr.mxu0 %v490_v0 }
  0x2f   :  { %462 = vmatpush3.msra.mxu0 %v224_v40 }
  0x30   :  { %463 = vmatprep.subr.mxu0 %v490_v0 }
  0x31   :  { %464 = vmatpush3.msra.mxu0 %v223_v41 }
  0x32   :  { %465 = vmatprep.subr.mxu0 %v490_v0 }
  0x33   :  { %466 = vmatpush3.msra.mxu0 %v222_v42 }
  0x34   :  { %467 = vmatprep.subr.mxu0 %v490_v0 }
  0x35   :  { %468 = vmatpush3.msra.mxu0 %v221_v43 }
  0x36   :  { %469 = vmatprep.subr.mxu0 %v490_v0 }
  0x37   :  { %470 = vmatpush3.msra.mxu0 %v220_v44 }
  0x38   :  { %471 = vmatprep.subr.mxu0 %v490_v0 }
  0x39   :  { %472 = vmatpush3.msra.mxu0 %v219_v45 }
  0x3a   :  { %473 = vmatprep.subr.mxu0 %v490_v0 }
  0x3b   :  { %474 = vmatpush3.msra.mxu0 %v218_v46 }
  0x3c   :  { %475 = vmatprep.subr.mxu0 %v490_v0 }
  0x3d   :  { %476 = vmatpush3.msra.mxu0 %v217_v52 }
  0x3e   :  { %477 = vmatprep.subr.mxu0 %v490_v0 }
  0x3f   :  { %478 = vmatpush3.msra.mxu0 %v216_v53 }
  0x40   :  { %479 = vmatprep.subr.mxu0 %v490_v0 }
  0x41   :  { %480 = vmatpush3.msra.mxu0 %v215_v54 }
  0xe1   :  { %v116_v48 = vpop.f32.mrf.mxu0 }
  0xe2   :  { %v117_v49 = vadd.f32 %v324_v47, %v116_v48 }
  0xe3   :  { %v413_v50 = vpop.f32.mrf.mxu0 }
  0xe4   :  { %v120_v51 = vmax.f32 %v117_v49, 0.0 }
  0xe6   :  { %447 = vmatmul.mubr.f32.vlgmr.msra.gmra.mxu1 %v120_v51 }
 0x1a6   :  { %v210_v56 = vpop.f32.mrf.mxu1 }
 0x1a7   :  { %v211_v57 = vadd.f32 %v325_v55, %v210_v56 }
 0x1a8   :  { %v448_v58 = vpop.f32.mrf.mxu1 }
 0x1a9   :  { %v214_v59 = vmax.f32 %v211_v57, 0.0 }
 0x1ab   :  { %482 = vmatmul.mubr.f32.vlgmr.msra.gmra.mxu0 %v214_v59 }
 0x26b   :  { %v304_v61 = vpop.f32.mrf.mxu0 }
 0x26c   :  { %v305_v62 = vadd.f32 %v326_v60, %v304_v61 }
 0x26d   :  { %v483_v63 = vpop.f32.mrf.mxu0 }
 0x26e   :  { %v327_v0 = vmul.f32 -1.442695, %v305_v62 }
 0x270   :  { %486 = vpow2.f32 %v327_v0 }
 0x27d   :  { %v487_v1 = vpop.eup %486 }
 0x27e   :  { %v314_v2 = vadd.f32 1.0, %v487_v1 }
 0x280   :  { %488 = vrcp.f32 %v314_v2 }
 0x28d   :  { %v489_v5 = vpop.eup %488 }
 0x28e   :  { %v317_v6 = vsel %vm310_vm1, %v305_v62, %v489_v5 }
 0x28f   :  { %319 = vst.msk [vmem:[%s752_s7] sm:$0x3] %vm318_vm2, %v317_v6 }

// kernel: forward.11
= control target key start
LH: loop header
LB: loop body
LE: loop exit
PB: predicated region body
PF: predicated region fallthrough
CT: control target
= control target key end

     0   :  { %vm33_vm0 = vcmask 1043456   ;;  %v145_v0 = vmov 0.0   ;;  %vm146_vm1 = vmmov 0   ;;  %v147_v3 = vmov 0   ;;  %s200_s0 = inlined_call_operand.vmem [shape: f32[1,36,128], index: 0, kind: input, shape index: {}]   ;;  %s201_s2 = inlined_call_operand.vmem [shape: f32[4,1], index: 2, kind: input, shape index: {}]   ;;  %s202_s3 = inlined_call_operand.vmem [shape: f32[4,1], index: 3, kind: input, shape index: {}]   ;;  %s203_s1 = inlined_call_operand.vmem [shape: f32[4,36], index: 1, kind: input, shape index: {}]   ;;  %s204_s4 = inlined_call_operand.vmem [shape: f32[4,128], index: 4, kind: output, shape index: {}]  }
   0x1   :  { %128 = vmatprep.subr.mxu0 %v145_v0  ;;  %v23_v1 = vld [vmem:[%s200_s0 + $0x20] sm:$0xf]  ;;  %v22_v2 = vld [vmem:[%s200_s0 + $0x18] sm:$0xff]  ;;  %138 = vmatprep.mubr.msk.f32.mxu0 %vm146_vm1, %v145_v0  ;;  %v21_v4 = vld [vmem:[%s200_s0 + $0x10] sm:$0xff]  ;;  %vm29_vm2 = vcmask 293888  }
   0x2   :  { %129 = vmatpush3.msk.msra.mxu0 %vm33_vm0, %v23_v1  ;;  %144 = vset.pattern.permute.xlu0 %v147_v3  ;;  %v18_v5 = vld [vmem:[%s201_s2] sm:$0xf]  ;;  %v20_v6 = vld [vmem:[%s200_s0 + $0x8] sm:$0xff] }
   0x3   :  { %130 = vmatprep.subr.mxu0 %v145_v0  ;;  %26 = vperm.xlu0 %144, %v18_v5   ;;  %v108_v7 = vld [vmem:[%s202_s3] sm:$0xf] }
   0x4   :  { %131 = vmatpush3.msra.mxu0 %v22_v2  ;;  %v19_v8 = vld [vmem:[%s200_s0] sm:$0xff] }
   0x5   :  { %132 = vmatprep.subr.mxu0 %v145_v0  ;;  %v17_v9 = vld [vmem:[%s203_s1] sm:$0xf] }
   0x6   :  { %133 = vmatpush3.msra.mxu0 %v21_v4 }
   0x7   :  { %134 = vmatprep.subr.mxu0 %v145_v0  ;;  %111 = vperm.xlu0 %144, %v108_v7  }
   0x8   :  { %135 = vmatpush3.msra.mxu0 %v20_v6 }
   0x9   :  { %136 = vmatprep.subr.mxu0 %v145_v0 }
   0xa   :  { %137 = vmatpush3.msra.mxu0 %v19_v8 }
   0xb   :  { %139 = vmatmul.mubr.msk.f32.vlgmr.msra.gmra.mxu0 %vm29_vm2, %v17_v9 }
  0x7e   :  { %v27_v10 = vpop.permute.xlu0 %26 }
  0x82   :  { %v112_v15 = vpop.permute.xlu0 %111 }
  0xcb   :  { %v103_v11 = vpop.f32.mrf.mxu0 }
  0xcc   :  { %v104_v12 = vadd.f32 %v103_v11, %v27_v10 }
  0xcd   :  { %v140_v13 = vpop.f32.mrf.mxu0 }
  0xce   :  { %v107_v14 = vmax.f32 %v104_v12, 0.0 }
  0xd0   :  { %v114_v16 = vadd.f32 %v112_v15, %v107_v14 }
  0xd2   :  { %115 = vst [vmem:[%s204_s4] sm:$0xf] %v114_v16 }

// kernel: forward.12
= control target key start
LH: loop header
LB: loop body
LE: loop exit
PB: predicated region body
PF: predicated region fallthrough
CT: control target
= control target key end

     0   :  { %vm38_vm0 = vcmask 1043456   ;;  %v149_v3 = vmov 0.0   ;;  %v150_v4 = vmov 0   ;;  %vm34_vm1 = vcmask 293888   ;;  %s218_s0 = inlined_call_operand.vmem [shape: f32[1,36,256], index: 0, kind: input, shape index: {}]   ;;  %s219_s2 = inlined_call_operand.vmem [shape: f32[2,1], index: 2, kind: input, shape index: {}]   ;;  %s220_s3 = inlined_call_operand.vmem [shape: f32[2,1], index: 3, kind: input, shape index: {}]   ;;  %s221_s1 = inlined_call_operand.vmem [shape: f32[2,36], index: 1, kind: input, shape index: {}]   ;;  %s222_s4 = inlined_call_operand.vmem [shape: f32[2,256], index: 4, kind: output, shape index: {}]  }
   0x1   :  { %v28_v0 = vld [vmem:[%s218_s0 + $0x48] sm:$0xf]  ;;  %v27_v1 = vld [vmem:[%s218_s0 + $0x40] sm:$0xf]  ;;  %v26_v2 = vld [vmem:[%s218_s0 + $0x38] sm:$0xff]  ;;  %109 = vmatprep.mubr.f32.mxu0 %v149_v3  ;;  %148 = vset.pattern.permute.xlu0 %v150_v4 }
   0x2   :  { %142 = vmatprep.subr.msk.mxu0 %vm38_vm0, %v28_v0  ;;  %v25_v5 = vld [vmem:[%s218_s0 + $0x30] sm:$0xff]  ;;  %v24_v6 = vld [vmem:[%s218_s0 + $0x28] sm:$0xff]  ;;  %v23_v7 = vld [vmem:[%s218_s0 + $0x20] sm:$0xff] }
   0x3   :  { %143 = vmatpush1.msk.msra.mxu0 %vm38_vm0, %v27_v1  ;;  %v18_v8 = vld [vmem:[%s219_s2] sm:$0x3]  ;;  %v22_v9 = vld [vmem:[%s218_s0 + $0x18] sm:$0xff]  ;;  %v21_v10 = vld [vmem:[%s218_s0 + $0x10] sm:$0xff] }
   0x4   :  { %69 = vmatprep.subr.mxu0 %v26_v2  ;;  %31 = vperm.xlu0 %148, %v18_v8   ;;  %v118_v11 = vld [vmem:[%s220_s3] sm:$0x3]  ;;  %v20_v12 = vld [vmem:[%s218_s0 + $0x8] sm:$0xff] }
   0x5   :  { %70 = vmatpush1.msra.mxu0 %v25_v5  ;;  %v19_v13 = vld [vmem:[%s218_s0] sm:$0xff] }
   0x6   :  { %71 = vmatprep.subr.mxu0 %v24_v6  ;;  %v17_v14 = vld [vmem:[%s221_s1] sm:$0x3] }
   0x7   :  { %72 = vmatpush1.msra.mxu0 %v23_v7 }
   0x8   :  { %73 = vmatprep.subr.mxu0 %v22_v9  ;;  %121 = vperm.xlu0 %148, %v118_v11  }
   0x9   :  { %74 = vmatpush1.msra.mxu0 %v21_v10 }
   0xa   :  { %75 = vmatprep.subr.mxu0 %v20_v12 }
   0xb   :  { %76 = vmatpush1.msra.mxu0 %v19_v13 }
   0xc   :  { %144 = vmatmul.mubr.msk.f32.vlgmr.msra.gmra.mxu0 %vm34_vm1, %v17_v14 }
  0x7f   :  { %v32_v15 = vpop.permute.xlu0 %31 }
  0x83   :  { %v122_v22 = vpop.permute.xlu0 %121 }
  0xcc   :  { %v111_v16 = vpop.f32.mrf.mxu0 }
  0xcd   :  { %v112_v17 = vadd.f32 %v111_v16, %v32_v15 }
  0xce   :  { %v113_v18 = vpop.f32.mrf.mxu0 }
  0xcf   :  { %v116_v19 = vmax.f32 %v112_v17, 0.0  ;;  %v114_v20 = vadd.f32 %v113_v18, %v32_v15 }
  0xd1   :  { %v117_v21 = vmax.f32 %v114_v20, 0.0  ;;  %v124_v23 = vadd.f32 %v122_v22, %v116_v19 }
  0xd3   :  { %v125_v24 = vadd.f32 %v122_v22, %v117_v21 }
  0xd5   :  { %v128_v25 = vcombine.low %v124_v23, %v125_v24 }
  0xd7   :  { %145 = vst.sshfl [vmem:[%s222_s4] sm:$0x33 pattern:$0x76325410] %v128_v25 }

// kernel: forward.13
= control target key start
LH: loop header
LB: loop body
LE: loop exit
PB: predicated region body
PF: predicated region fallthrough
CT: control target
= control target key end

     0   :  { %vm60_vm0 = vcmask 1041408   ;;  %v554_v3 = vmov 0.0   ;;  %vm56_vm1 = vcmask 146432   ;;  %v555_v29 = vmov 0   ;;  %s686_s0 = inlined_call_operand.vmem [shape: f32[1,18,1024], index: 0, kind: input, shape index: {}]   ;;  %s687_s2 = inlined_call_operand.<no memory space> [shape: f32[1,1], index: 2, kind: input, shape index: {}]   ;;  %s688_s3 = inlined_call_operand.<no memory space> [shape: f32[1,1], index: 3, kind: input, shape index: {}]   ;;  %s689_s1 = inlined_call_operand.vmem [shape: f32[1,18], index: 1, kind: input, shape index: {}]   ;;  %s690_s4 = inlined_call_operand.vmem [shape: f32[1,1024], index: 4, kind: output, shape index: {}]  }
   0x1   :  { %v40_v0 = vld [vmem:[%s686_s0 + $0x88] sm:$0x3]  ;;  %v42_v1 = vld [vmem:[%s686_s0 + $0x98] sm:$0x3]  ;;  %v39_v2 = vld [vmem:[%s686_s0 + $0x80] sm:$0x3]  ;;  %149 = vmatprep.mubr.f32.mxu0 %v554_v3  ;;  %220 = vmatprep.mubr.f32.mxu1 %v554_v3  ;;  %v9_v4 = vstv %s687_s2  ;;  %v52_v31 = vlaneseq }
   0x2   :  { %498 = vmatprep.subr.msk.mxu0 %vm60_vm0, %v40_v0  ;;  %501 = vmatprep.subr.msk.mxu1 %vm60_vm0, %v42_v1  ;;  %v41_v5 = vld [vmem:[%s686_s0 + $0x90] sm:$0x3]  ;;  %v32_v6 = vld [vmem:[%s686_s0 + $0x48] sm:$0xff]  ;;  %v34_v7 = vld [vmem:[%s686_s0 + $0x58] sm:$0xff]  ;;  %10 = vst [vmem:[#allocation2] sm:$0x1] %v9_v4  ;;  %v11_v8 = vstv %s688_s3 }
   0x3   :  { %499 = vmatpush1.msk.msra.mxu0 %vm60_vm0, %v39_v2  ;;  %502 = vmatpush1.msk.msra.mxu1 %vm60_vm0, %v41_v5  ;;  %v31_v9 = vld [vmem:[%s686_s0 + $0x40] sm:$0xff]  ;;  %v33_v10 = vld [vmem:[%s686_s0 + $0x50] sm:$0xff]  ;;  %v24_v11 = vld [vmem:[%s686_s0 + $0x8] sm:$0xff]  ;;  %12 = vst [vmem:[#allocation3] sm:$0x1] %v11_v8  ;;  %v675_v32 = vshrl.u32 %v52_v31, 7 }
   0x4   :  { %113 = vmatprep.subr.mxu0 %v32_v6  ;;  %184 = vmatprep.subr.mxu1 %v34_v7  ;;  %v26_v12 = vld [vmem:[%s686_s0 + $0x18] sm:$0xff]  ;;  %v23_v13 = vld [vmem:[%s686_s0] sm:$0xff]  ;;  %v25_v14 = vld [vmem:[%s686_s0 + $0x10] sm:$0xff] }
   0x5   :  { %114 = vmatpush1.msra.mxu0 %v31_v9  ;;  %185 = vmatpush1.msra.mxu1 %v33_v10  ;;  %v21_v15 = vld [vmem:[%s689_s1] sm:$0x1]  ;;  %v44_v16 = vld [vmem:[%s686_s0 + $0xa8] sm:$0x3]  ;;  %v46_v17 = vld [vmem:[%s686_s0 + $0xb8] sm:$0x3] }
   0x6   :  { %115 = vmatprep.subr.mxu0 %v24_v11  ;;  %186 = vmatprep.subr.mxu1 %v26_v12  ;;  %v43_v18 = vld [vmem:[%s686_s0 + $0xa0] sm:$0x3]  ;;  %v45_v19 = vld [vmem:[%s686_s0 + $0xb0] sm:$0x3]  ;;  %v36_v20 = vld [vmem:[%s686_s0 + $0x68] sm:$0xff]  ;;  %v54_v33 = vsub.s32 0, %v675_v32 }
   0x7   :  { %116 = vmatpush1.msra.mxu0 %v23_v13  ;;  %187 = vmatpush1.msra.mxu1 %v25_v14  ;;  %v38_v21 = vld [vmem:[%s686_s0 + $0x78] sm:$0xff]  ;;  %v35_v22 = vld [vmem:[%s686_s0 + $0x60] sm:$0xff]  ;;  %v37_v23 = vld [vmem:[%s686_s0 + $0x70] sm:$0xff]  ;;  %v556_v14 = vmov 1966171168  }
   0x8   :  { %500 = vmatmul.mubr.msk.f32.vlgmr.msra.gmra.mxu0 %vm56_vm1, %v21_v15  ;;  %503 = vmatmul.mubr.msk.f32.vlgmr.msra.gmra.mxu1 %vm56_vm1, %v21_v15  ;;  %v28_v24 = vld [vmem:[%s686_s0 + $0x28] sm:$0xff]  ;;  %v30_v25 = vld [vmem:[%s686_s0 + $0x38] sm:$0xff]  ;;  %v27_v26 = vld [vmem:[%s686_s0 + $0x20] sm:$0xff] }
   0x9   :  { %504 = vmatprep.subr.msk.mxu0 %vm60_vm0, %v44_v16  ;;  %507 = vmatprep.subr.msk.mxu1 %vm60_vm0, %v46_v17  ;;  %v29_v27 = vld [vmem:[%s686_s0 + $0x30] sm:$0xff]  ;;  %v22_v28 = vld [vmem:[#allocation2] sm:$0x1] }
   0xa   :  { %505 = vmatpush1.msk.msra.mxu0 %vm60_vm0, %v43_v18  ;;  %508 = vmatpush1.msk.msra.mxu1 %vm60_vm0, %v45_v19  ;;  %v417_v30 = vld [vmem:[#allocation3] sm:$0x1] }
   0xb   :  { %255 = vmatprep.subr.mxu0 %v36_v20  ;;  %326 = vmatprep.subr.mxu1 %v38_v21 }
   0xc   :  { %256 = vmatpush1.msra.mxu0 %v35_v22  ;;  %327 = vmatpush1.msra.mxu1 %v37_v23 }
   0xd   :  { %257 = vmatprep.subr.mxu0 %v28_v24  ;;  %328 = vmatprep.subr.mxu1 %v30_v25 }
   0xe   :  { %258 = vmatpush1.msra.mxu0 %v27_v26  ;;  %291 = vmatprep.mubr.f32.mxu0 %v554_v3 }
   0xf   :  { %329 = vmatpush1.msra.mxu1 %v29_v27  ;;  %362 = vmatprep.mubr.f32.mxu1 %v554_v3 }
  0x10   :  { %506 = vmatmul.mubr.msk.f32.vlgmr.msra.gmra.mxu0 %vm56_vm1, %v21_v15  ;;  %509 = vmatmul.mubr.msk.f32.vlgmr.msra.gmra.mxu1 %vm56_vm1, %v21_v15  ;;  %v448_v15 = vunpack.c.l.s4 %v556_v14 }
  0x11   :  { %521 = vset.pattern.permute.xlu0 %v555_v29 }
  0x12   :  { %49 = vperm.xlu0 %521, %v22_v28   ;;  %v449_v20 = vunpack.c.0.s8 %v448_v15 }
  0x14   :  { %v452_v26 = vsub.s32 %v449_v20, %v675_v32 }
  0x16   :  { %420 = vperm.xlu0 %521, %v417_v30  }
  0x8d   :  { %v50_v34 = vpop.permute.xlu0 %49 }
  0x8e   :  { %v55_v35 = vrot.slane %v50_v34, %v54_v33 }
  0x91   :  { %v421_v12 = vpop.permute.xlu0 %420 }
  0x92   :  { %v426_v18 = vrot.slane %v421_v12, %v54_v33 }
  0xc8   :  { %v151_v36 = vpop.f32.mrf.mxu0  ;;  %v222_v37 = vpop.f32.mrf.mxu1 }
  0xc9   :  { %v152_v38 = vadd.f32 %v151_v36, %v55_v35  ;;  %v223_v39 = vadd.f32 %v222_v37, %v55_v35 }
  0xca   :  { %v153_v40 = vpop.f32.mrf.mxu0  ;;  %v224_v41 = vpop.f32.mrf.mxu1 }
  0xcb   :  { %v510_v42 = vmul.f32 -1.442695, %v152_v38  ;;  %v512_v43 = vmul.f32 -1.442695, %v223_v39  ;;  %v154_v44 = vadd.f32 %v153_v40, %v55_v35  ;;  %v225_v45 = vadd.f32 %v224_v41, %v55_v35 }
  0xcd   :  { %522 = vpow2.f32 %v510_v42  ;;  %v511_v46 = vmul.f32 -1.442695, %v154_v44  ;;  %v513_v47 = vmul.f32 -1.442695, %v225_v45 }
  0xce   :  { %524 = vpow2.f32 %v512_v43 }
  0xcf   :  { %526 = vpow2.f32 %v511_v46 }
  0xd0   :  { %528 = vpow2.f32 %v513_v47  ;;  %v293_v48 = vpop.f32.mrf.mxu0  ;;  %v364_v49 = vpop.f32.mrf.mxu1 }
  0xd1   :  { %v294_v50 = vadd.f32 %v293_v48, %v55_v35  ;;  %v365_v51 = vadd.f32 %v364_v49, %v55_v35 }
  0xd2   :  { %v295_v52 = vpop.f32.mrf.mxu0  ;;  %v366_v53 = vpop.f32.mrf.mxu1 }
  0xd3   :  { %v514_v54 = vmul.f32 -1.442695, %v294_v50  ;;  %v516_v55 = vmul.f32 -1.442695, %v365_v51  ;;  %v296_v56 = vadd.f32 %v295_v52, %v55_v35  ;;  %v367_v57 = vadd.f32 %v366_v53, %v55_v35 }
  0xd5   :  { %530 = vpow2.f32 %v514_v54  ;;  %v515_v58 = vmul.f32 -1.442695, %v296_v56  ;;  %v517_v59 = vmul.f32 -1.442695, %v367_v57 }
  0xd6   :  { %532 = vpow2.f32 %v516_v55 }
  0xd7   :  { %534 = vpow2.f32 %v515_v58 }
  0xd8   :  { %536 = vpow2.f32 %v517_v59 }
  0xda   :  { %v523_v60 = vpop.eup %522 }
  0xdb   :  { %v525_v61 = vpop.eup %524  ;;  %v393_v62 = vadd.f32 1.0, %v523_v60 }
  0xdc   :  { %v527_v63 = vpop.eup %526  ;;  %v395_v0 = vadd.f32 1.0, %v525_v61 }
  0xdd   :  { %v529_v1 = vpop.eup %528  ;;  %538 = vrcp.f32 %v393_v62  ;;  %v394_v2 = vadd.f32 1.0, %v527_v63 }
  0xde   :  { %540 = vrcp.f32 %v395_v0  ;;  %v396_v3 = vadd.f32 1.0, %v529_v1 }
  0xdf   :  { %542 = vrcp.f32 %v394_v2 }
  0xe0   :  { %544 = vrcp.f32 %v396_v3 }
  0xe2   :  { %v531_v4 = vpop.eup %530 }
  0xe3   :  { %v533_v5 = vpop.eup %532  ;;  %v397_v6 = vadd.f32 1.0, %v531_v4 }
  0xe4   :  { %v535_v7 = vpop.eup %534  ;;  %v399_v8 = vadd.f32 1.0, %v533_v5 }
  0xe5   :  { %v537_v9 = vpop.eup %536  ;;  %546 = vrcp.f32 %v397_v6  ;;  %v398_v10 = vadd.f32 1.0, %v535_v7 }
  0xe6   :  { %548 = vrcp.f32 %v399_v8  ;;  %v400_v11 = vadd.f32 1.0, %v537_v9 }
  0xe7   :  { %550 = vrcp.f32 %v398_v10 }
  0xe8   :  { %552 = vrcp.f32 %v400_v11 }
  0xea   :  { %v539_v13 = vpop.eup %538 }
  0xeb   :  { %v541_v16 = vpop.eup %540  ;;  %v427_v23 = vadd.f32 %v539_v13, %v426_v18 }
  0xec   :  { %v543_v17 = vpop.eup %542  ;;  %v429_v24 = vadd.f32 %v541_v16, %v426_v18 }
  0xed   :  { %v545_v19 = vpop.eup %544  ;;  %v428_v21 = vadd.f32 %v543_v17, %v426_v18 }
  0xee   :  { %v430_v22 = vadd.f32 %v545_v19, %v426_v18 }
  0xef   :  { %v443_v27 = vcombine.low %v427_v23, %v428_v21 }
  0xf0   :  { %v444_v28 = vcombine.low %v429_v24, %v430_v22 }
  0xf1   :  { %v453_v38 = vrot.slane %v443_v27, %v452_v26 }
  0xf2   :  { %v547_v25 = vpop.eup %546  ;;  %v460_v33 = vrot.slane %v444_v28, %v452_v26 }
  0xf3   :  { %v549_v29 = vpop.eup %548  ;;  %v431_v34 = vadd.f32 %v547_v25, %v426_v18 }
  0xf4   :  { %v551_v30 = vpop.eup %550  ;;  %v433_v36 = vadd.f32 %v549_v29, %v426_v18  ;;  %v475_v43 = vcombine.low %v453_v38, %v460_v33 }
  0xf5   :  { %v553_v31 = vpop.eup %552  ;;  %v432_v35 = vadd.f32 %v551_v30, %v426_v18 }
  0xf6   :  { %v434_v37 = vadd.f32 %v553_v31, %v426_v18  ;;  %v483_v45 = vrot.slane %v475_v43, %v452_v26 }
  0xf7   :  { %v445_v39 = vcombine.low %v431_v34, %v432_v35 }
  0xf8   :  { %v446_v40 = vcombine.low %v433_v36, %v434_v37 }
  0xf9   :  { %v467_v41 = vrot.slane %v445_v39, %v452_v26 }
  0xfa   :  { %v474_v42 = vrot.slane %v446_v40, %v452_v26 }
  0xfc   :  { %v476_v44 = vcombine.low %v467_v41, %v474_v42 }
  0xfe   :  { %v490_v46 = vrot.slane %v476_v44, %v452_v26 }
 0x100   :  { %v491_v32 = vcombine.low %v483_v45, %v490_v46 }
 0x102   :  { %493 = vst [vmem:[%s690_s4] sm:$0xff] %v491_v32 }

</bundles_post_ra>
